<compile_context>
chip_gen: v7x
topology: tpu7x:2x2x1
jax: 0.10.0
libtpu: 0.0.40
codegen_flags: <defaults>
</compile_context>

<pallas_src>
import math

import jax
import jax.numpy as jnp
from jax.experimental import pallas as pl
from jax.experimental.pallas import tpu as pltpu

D_MODEL = 128          # keep the (*, d_model) last dim lane-friendly on TPU
N_HEADS = 8
HEAD_DIM = D_MODEL // N_HEADS
LN_EPS = 1e-5
NEG_BIG = -1e30


def _encoder_post_kernel(src_ref, prmpt_ref, kpos_ref, maskb_ref,
                         wq_ref, bq_ref, wk_ref, bk_ref, wv_ref, bv_ref,
                         wo_ref, bo_ref, gamma_ref, beta_ref,
                         bdmask_ref, seg_ref, out_ref):
    Bb, L, D = src_ref.shape
    S = prmpt_ref.shape[1]
    HS = bdmask_ref.shape[0]            # n_heads * S  (lane-packed head axis)
    H = HS // S

    src = src_ref[...]                                   # (Bb, L, D) f32
    prm = prmpt_ref[...]                                 # (Bb, S, D) f32
    kin = prm + kpos_ref[...]                            # key = prmpt + pos

    # --- QKV projections on the whole batch block (K = D = 128, bf16 MXU) ----
    src2 = src.reshape(Bb * L, D)
    q = jnp.dot(src2.astype(jnp.bfloat16), wq_ref[...],
                preferred_element_type=jnp.float32) + bq_ref[...]
    k = jnp.dot(kin.reshape(Bb * S, D).astype(jnp.bfloat16), wk_ref[...],
                preferred_element_type=jnp.float32) + bk_ref[...]
    v = jnp.dot(prm.reshape(Bb * S, D).astype(jnp.bfloat16), wv_ref[...],
                preferred_element_type=jnp.float32) + bv_ref[...]

    # --- Block-diagonal packed K / V: (Bb, H*S, D); row block h keeps only ---
    #     head h's HEAD_DIM lanes.  One batched matmul then yields per-head
    #     scores lane-PACKED along the last axis (H*S dense lanes) instead of
    #     the old lane-sparse (H*L, S=8) layout.  bdmask is a resident input.
    bdm = bdmask_ref[...]                                # (HS, D) bf16, 0/1
    kp = jnp.tile(k.reshape(Bb, S, D).astype(jnp.bfloat16), (1, H, 1)) * bdm[None]
    vp = jnp.tile(v.reshape(Bb, S, D).astype(jnp.bfloat16), (1, H, 1)) * bdm[None]

    qb = q.reshape(Bb, L, D).astype(jnp.bfloat16)
    s = jnp.einsum('bld,bed->ble', qb, kp,
                   preferred_element_type=jnp.float32)   # (Bb, L, HS) f32
    s = s * (1.0 / math.sqrt(HEAD_DIM)) + maskb_ref[...] # packed key-pad bias

    # --- Lane-dense per-head softmax (all math in f32). ----------------------
    # Shift by the per-row (all heads) max: softmax is shift-invariant so this
    # is exact; it also keeps all-masked rows finite (uniform) as before
    # (PyTorch MHA would produce NaN on that edge case).
    mx = jnp.max(s, axis=-1, keepdims=True)
    p = jnp.exp(s - mx)
    # Per-head denominators via one tiny f32 MXU matmul with the block-diagonal
    # ones matrix -> denominators arrive already broadcast across each head's
    # S lanes; no lane-sparse reshape/reduce needed.
    denom = jnp.dot(p.reshape(Bb * L, HS), seg_ref[...],
                    preferred_element_type=jnp.float32).reshape(Bb, L, HS)
    p = p * pl.reciprocal(denom, approx=True)

    # --- Context: single batched (L, HS) x (HS, D) matmul against packed V ---
    ctx = jnp.einsum('ble,bed->bld', p.astype(jnp.bfloat16), vp,
                     preferred_element_type=jnp.float32)  # (Bb, L, D) f32

    # --- Output projection (full K = D), residual, LayerNorm (f32). ----------
    attn = jnp.dot(ctx.reshape(Bb * L, D).astype(jnp.bfloat16), wo_ref[...],
                   preferred_element_type=jnp.float32) + bo_ref[...]
    x = src2 + attn
    mu = jnp.mean(x, axis=-1, keepdims=True)
    xc = x - mu
    var = jnp.mean(xc * xc, axis=-1, keepdims=True)
    y = xc * jax.lax.rsqrt(var + LN_EPS)
    y = y * gamma_ref[...] + beta_ref[...]
    out_ref[...] = y.reshape(Bb, L, D).astype(out_ref.dtype)


def global_encoder_layer_post(src_lbd, src_pos_embed, prmpt_sbd, prmpt_mask_sb,
                              prmpt_pos_embed_sbd, params, *, block_b=8):
    """forward_post semantics.

    src_lbd:             (L, B, D) float32
    src_pos_embed:       (L, B, D) -- unused on the post_norm path (kept for parity)
    prmpt_sbd:           (S, B, D)
    prmpt_mask_sb:       (S, B) bool, True = ignore key (transposed inside, as in torch)
    prmpt_pos_embed_sbd: (S, B, D) or None
    """
    del src_pos_embed  # not used by forward_post
    L, B, D = src_lbd.shape
    S = prmpt_sbd.shape[0]
    HS = N_HEADS * S
    assert D == D_MODEL
    assert L % 8 == 0 and S % 8 == 0, "seq lengths must be sublane-aligned"

    # Batch-major internally (see TODO at top about gridding the middle axis).
    src = jnp.transpose(src_lbd, (1, 0, 2))                       # (B, L, D)
    prm = jnp.transpose(prmpt_sbd, (1, 0, 2))                     # (B, S, D)
    if prmpt_pos_embed_sbd is None:
        kpos = jnp.zeros_like(prm)
    else:
        kpos = jnp.transpose(prmpt_pos_embed_sbd, (1, 0, 2))
    kpm = jnp.transpose(prmpt_mask_sb, (1, 0))                    # (B, S)
    bias = jnp.where(kpm, jnp.float32(NEG_BIG), jnp.float32(0.0))
    # Lane-packed key-padding bias: [b, 0, h*S + s'] = bias[b, s'].
    mask_bias = jnp.tile(bias[:, None, :], (1, 1, N_HEADS))       # (B, 1, HS)

    # Loop-invariant packing masks (constant index_map -> DMA'd once, resident).
    col_head = jnp.arange(D, dtype=jnp.int32) // HEAD_DIM                 # (D,)
    row_head = jnp.arange(HS, dtype=jnp.int32) // S                       # (HS,)
    bd_mask = (row_head[:, None] == col_head[None, :]).astype(jnp.bfloat16)   # (HS, D)
    seg_ones = (row_head[:, None] == row_head[None, :]).astype(jnp.float32)   # (HS, HS)

    # bf16 weights for the MXU (halves weight DMA + resident VMEM); biases and
    # LN params stay f32, as does all softmax / LayerNorm math (v5e-safe).
    wq = params["wq"].astype(jnp.bfloat16)
    wk = params["wk"].astype(jnp.bfloat16)
    wv = params["wv"].astype(jnp.bfloat16)
    wo = params["wo"].astype(jnp.bfloat16)

    # Pad the batch to a multiple of the batch block (padded rows are discarded).
    Bb = min(block_b, B)
    Bp = pl.cdiv(B, Bb) * Bb
    if Bp != B:
        pad = Bp - B
        src = jnp.pad(src, ((0, pad), (0, 0), (0, 0)))
        prm = jnp.pad(prm, ((0, pad), (0, 0), (0, 0)))
        kpos = jnp.pad(kpos, ((0, pad), (0, 0), (0, 0)))
        mask_bias = jnp.pad(mask_bias, ((0, pad), (0, 0), (0, 0)))

    mat_spec = lambda: pl.BlockSpec((D, D), lambda b: (0, 0))
    vec_spec = lambda: pl.BlockSpec((1, D), lambda b: (0, 0))

    out_bld = pl.pallas_call(
        _encoder_post_kernel,
        out_shape=jax.ShapeDtypeStruct((Bp, L, D), src.dtype),
        grid_spec=pltpu.PrefetchScalarGridSpec(
            num_scalar_prefetch=0,
            grid=(Bp // Bb,),
            in_specs=[
                pl.BlockSpec((Bb, L, D), lambda b: (b, 0, 0)),    # src
                pl.BlockSpec((Bb, S, D), lambda b: (b, 0, 0)),    # prmpt
                pl.BlockSpec((Bb, S, D), lambda b: (b, 0, 0)),    # prmpt pos embed
                pl.BlockSpec((Bb, 1, HS), lambda b: (b, 0, 0)),   # packed key-pad bias
                mat_spec(), vec_spec(),                           # Wq, bq
                mat_spec(), vec_spec(),                           # Wk, bk
                mat_spec(), vec_spec(),                           # Wv, bv
                mat_spec(), vec_spec(),                           # Wo, bo
                vec_spec(), vec_spec(),                           # gamma, beta
                pl.BlockSpec((HS, D), lambda b: (0, 0)),          # block-diag head mask
                pl.BlockSpec((HS, HS), lambda b: (0, 0)),         # segment-ones
            ],
            out_specs=pl.BlockSpec((Bb, L, D), lambda b: (b, 0, 0)),
        ),
        compiler_params=pltpu.CompilerParams(
            dimension_semantics=("parallel",),                    # v7x: both TCs
            vmem_limit_bytes=32 * 1024 * 1024),
    )(src, prm, kpos, mask_bias,
      wq, params["bq"], wk, params["bk"], wv, params["bv"], wo, params["bo"],
      params["gamma"], params["beta"], bd_mask, seg_ones)

    return jnp.transpose(out_bld[:B], (1, 0, 2))                  # back to (L, B, D)


def _ref_forward_post(src_lbd, prmpt_sbd, prmpt_mask_sb, prmpt_pos_embed_sbd, params):
    """Pure-JAX reference of forward_post (batch-major internally, f32 HIGHEST)."""
    src = jnp.transpose(src_lbd, (1, 0, 2))
    prm = jnp.transpose(prmpt_sbd, (1, 0, 2))
    kpos = jnp.transpose(prmpt_pos_embed_sbd, (1, 0, 2))
    kpm = jnp.transpose(prmpt_mask_sb, (1, 0))
    B, L, D = src.shape
    S = prm.shape[1]

    q = src @ params["wq"] + params["bq"]
    k = (prm + kpos) @ params["wk"] + params["bk"]
    v = prm @ params["wv"] + params["bv"]
    qh = q.reshape(B, L, N_HEADS, HEAD_DIM).transpose(0, 2, 1, 3)
    kh = k.reshape(B, S, N_HEADS, HEAD_DIM).transpose(0, 2, 1, 3)
    vh = v.reshape(B, S, N_HEADS, HEAD_DIM).transpose(0, 2, 1, 3)
    s = jnp.einsum("bhld,bhsd->bhls", qh, kh,
                   precision=jax.lax.Precision.HIGHEST) / math.sqrt(HEAD_DIM)
    s = s + jnp.where(kpm, NEG_BIG, 0.0)[:, None, None, :]
    p = jax.nn.softmax(s, axis=-1)
    o = jnp.einsum("bhls,bhsd->bhld", p, vh,
                   precision=jax.lax.Precision.HIGHEST)
    o = o.transpose(0, 2, 1, 3).reshape(B, L, D) @ params["wo"] + params["bo"]
    x = src + o
    mu = x.mean(-1, keepdims=True)
    var = ((x - mu) ** 2).mean(-1, keepdims=True)
    y = (x - mu) / jnp.sqrt(var + LN_EPS) * params["gamma"] + params["beta"]
    return jnp.transpose(y, (1, 0, 2))


def _init_params(key):
    ks = jax.random.split(key, 8)
    scale = 0.05
    p = {
        # Weights are stored pre-transposed (used as x @ W).
        "wq": scale * jax.random.normal(ks[0], (D_MODEL, D_MODEL), jnp.float32),
        "wk": scale * jax.random.normal(ks[1], (D_MODEL, D_MODEL), jnp.float32),
        "wv": scale * jax.random.normal(ks[2], (D_MODEL, D_MODEL), jnp.float32),
        "wo": scale * jax.random.normal(ks[3], (D_MODEL, D_MODEL), jnp.float32),
        "bq": scale * jax.random.normal(ks[4], (1, D_MODEL), jnp.float32),
        "bk": scale * jax.random.normal(ks[5], (1, D_MODEL), jnp.float32),
        "bv": scale * jax.random.normal(ks[6], (1, D_MODEL), jnp.float32),
        "bo": scale * jax.random.normal(ks[7], (1, D_MODEL), jnp.float32),
        # nn.LayerNorm default init
        "gamma": jnp.ones((1, D_MODEL), jnp.float32),
        "beta": jnp.zeros((1, D_MODEL), jnp.float32),
    }
    return p
    # TODO(synk): linear1/linear2/norm3 (the FFN block) exist in __init__ but are
    # never used by the default post_norm forward path, so they are omitted here.


if __name__ == "__main__":
    key = jax.random.PRNGKey(0)
    k_src, k_spos, k_prm, k_ppos, k_par = jax.random.split(key, 5)

    L, S, B = 16, 8, 5          # B=5 with block_b=4 exercises multi-step grid + batch pad
    src = jax.random.normal(k_src, (L, B, D_MODEL), jnp.float32)
    src_pos_embed = jax.random.normal(k_spos, (L, B, D_MODEL), jnp.float32)
    prmpt = jax.random.normal(k_prm, (S, B, D_MODEL), jnp.float32)
    prmpt_pos_embed = jax.random.normal(k_ppos, (S, B, D_MODEL), jnp.float32)
    # (S, B) bool key-padding mask (True = ignore); mask last 2 prompt tokens of batch 1.
    prmpt_mask = jnp.zeros((S, B), jnp.bool_).at[-2:, 1].set(True)

    params = _init_params(k_par)

    out = global_encoder_layer_post(src, src_pos_embed, prmpt, prmpt_mask,
                                    prmpt_pos_embed, params, block_b=4)
    out = jax.block_until_ready(out)

    ref = _ref_forward_post(src, prmpt, prmpt_mask, prmpt_pos_embed, params)
    err = float(jnp.max(jnp.abs(out - ref)))
    if err > 2e-2:
        raise AssertionError(f"Pallas output mismatch vs reference: max |diff| = {err}")
    print("KERNEL_OK")
</pallas_src>

<mosaic_0001>
module attributes {stable_mosaic.version = 11 : i64} {
  func.func @_encoder_post_kernel(%arg0: i32, %arg1: memref<4x16x128xf32, #tpu.memory_space<vmem>>, %arg2: memref<4x8x128xf32, #tpu.memory_space<vmem>>, %arg3: memref<4x8x128xf32, #tpu.memory_space<vmem>>, %arg4: memref<4x1x64xf32, #tpu.memory_space<vmem>>, %arg5: memref<128x128xbf16, #tpu.memory_space<vmem>>, %arg6: memref<1x128xf32, #tpu.memory_space<vmem>>, %arg7: memref<128x128xbf16, #tpu.memory_space<vmem>>, %arg8: memref<1x128xf32, #tpu.memory_space<vmem>>, %arg9: memref<128x128xbf16, #tpu.memory_space<vmem>>, %arg10: memref<1x128xf32, #tpu.memory_space<vmem>>, %arg11: memref<128x128xbf16, #tpu.memory_space<vmem>>, %arg12: memref<1x128xf32, #tpu.memory_space<vmem>>, %arg13: memref<1x128xf32, #tpu.memory_space<vmem>>, %arg14: memref<1x128xf32, #tpu.memory_space<vmem>>, %arg15: memref<64x128xbf16, #tpu.memory_space<vmem>>, %arg16: memref<64x64xf32, #tpu.memory_space<vmem>>, %arg17: memref<4x16x128xf32, #tpu.memory_space<vmem>>) attributes {dimension_semantics = [#tpu.dimension_semantics<parallel>], iteration_bounds = array<i64: 2>, scalar_prefetch = 0 : i64, scratch_operands = 0 : i64, tpu.core_type = #tpu.core_type<tc>, window_params = [{transform_indices = @transform_0, window_bounds = array<i64: 4, 16, 128>}, {transform_indices = @transform_1, window_bounds = array<i64: 4, 8, 128>}, {transform_indices = @transform_2, window_bounds = array<i64: 4, 8, 128>}, {transform_indices = @transform_3, window_bounds = array<i64: 4, 1, 64>}, {pipeline_mode = #tpu.pipeline_mode<synchronous>, transform_indices = @transform_4, window_bounds = array<i64: 128, 128>}, {pipeline_mode = #tpu.pipeline_mode<synchronous>, transform_indices = @transform_5, window_bounds = array<i64: 1, 128>}, {pipeline_mode = #tpu.pipeline_mode<synchronous>, transform_indices = @transform_6, window_bounds = array<i64: 128, 128>}, {pipeline_mode = #tpu.pipeline_mode<synchronous>, transform_indices = @transform_7, window_bounds = array<i64: 1, 128>}, {pipeline_mode = #tpu.pipeline_mode<synchronous>, transform_indices = @transform_8, window_bounds = array<i64: 128, 128>}, {pipeline_mode = #tpu.pipeline_mode<synchronous>, transform_indices = @transform_9, window_bounds = array<i64: 1, 128>}, {pipeline_mode = #tpu.pipeline_mode<synchronous>, transform_indices = @transform_10, window_bounds = array<i64: 128, 128>}, {pipeline_mode = #tpu.pipeline_mode<synchronous>, transform_indices = @transform_11, window_bounds = array<i64: 1, 128>}, {pipeline_mode = #tpu.pipeline_mode<synchronous>, transform_indices = @transform_12, window_bounds = array<i64: 1, 128>}, {pipeline_mode = #tpu.pipeline_mode<synchronous>, transform_indices = @transform_13, window_bounds = array<i64: 1, 128>}, {pipeline_mode = #tpu.pipeline_mode<synchronous>, transform_indices = @transform_14, window_bounds = array<i64: 64, 128>}, {pipeline_mode = #tpu.pipeline_mode<synchronous>, transform_indices = @transform_15, window_bounds = array<i64: 64, 64>}, {transform_indices = @transform_16, window_bounds = array<i64: 4, 16, 128>}]} {
    %c0 = arith.constant 0 : index
    %c0_0 = arith.constant 0 : index
    %c0_1 = arith.constant 0 : index
    %0 = vector.load %arg1[%c0, %c0_0, %c0_1] : memref<4x16x128xf32, #tpu.memory_space<vmem>>, vector<4x16x128xf32>
    %c0_2 = arith.constant 0 : index
    %c0_3 = arith.constant 0 : index
    %c0_4 = arith.constant 0 : index
    %1 = vector.load %arg2[%c0_2, %c0_3, %c0_4] : memref<4x8x128xf32, #tpu.memory_space<vmem>>, vector<4x8x128xf32>
    %c0_5 = arith.constant 0 : index
    %c0_6 = arith.constant 0 : index
    %c0_7 = arith.constant 0 : index
    %2 = vector.load %arg3[%c0_5, %c0_6, %c0_7] : memref<4x8x128xf32, #tpu.memory_space<vmem>>, vector<4x8x128xf32>
    %3 = arith.addf %1, %2 : vector<4x8x128xf32>
    %4 = vector.shape_cast %0 : vector<4x16x128xf32> to vector<64x128xf32>
    %5 = arith.truncf %4 : vector<64x128xf32> to vector<64x128xbf16>
    %c0_8 = arith.constant 0 : index
    %c0_9 = arith.constant 0 : index
    %6 = vector.load %arg5[%c0_8, %c0_9] : memref<128x128xbf16, #tpu.memory_space<vmem>>, vector<128x128xbf16>
    %cst = arith.constant dense<0.000000e+00> : vector<64x128xf32>
    %7 = tpu.matmul %5, %6, %cst {dimension_numbers = #tpu.dot_dimension_numbers<[1], [0], [0], [1], [0, 0, 1, 1], [], []>} : vector<64x128xbf16>, vector<128x128xbf16>, vector<64x128xf32> -> vector<64x128xf32>
    %c0_10 = arith.constant 0 : index
    %c0_11 = arith.constant 0 : index
    %8 = vector.load %arg6[%c0_10, %c0_11] : memref<1x128xf32, #tpu.memory_space<vmem>>, vector<1x128xf32>
    %9 = vector.broadcast %8 : vector<1x128xf32> to vector<64x128xf32>
    %10 = arith.addf %7, %9 : vector<64x128xf32>
    %11 = vector.shape_cast %3 : vector<4x8x128xf32> to vector<32x128xf32>
    %12 = arith.truncf %11 : vector<32x128xf32> to vector<32x128xbf16>
    %c0_12 = arith.constant 0 : index
    %c0_13 = arith.constant 0 : index
    %13 = vector.load %arg7[%c0_12, %c0_13] : memref<128x128xbf16, #tpu.memory_space<vmem>>, vector<128x128xbf16>
    %cst_14 = arith.constant dense<0.000000e+00> : vector<32x128xf32>
    %14 = tpu.matmul %12, %13, %cst_14 {dimension_numbers = #tpu.dot_dimension_numbers<[1], [0], [0], [1], [0, 0, 1, 1], [], []>} : vector<32x128xbf16>, vector<128x128xbf16>, vector<32x128xf32> -> vector<32x128xf32>
    %c0_15 = arith.constant 0 : index
    %c0_16 = arith.constant 0 : index
    %15 = vector.load %arg8[%c0_15, %c0_16] : memref<1x128xf32, #tpu.memory_space<vmem>>, vector<1x128xf32>
    %16 = vector.broadcast %15 : vector<1x128xf32> to vector<32x128xf32>
    %17 = arith.addf %14, %16 : vector<32x128xf32>
    %18 = vector.shape_cast %1 : vector<4x8x128xf32> to vector<32x128xf32>
    %19 = arith.truncf %18 : vector<32x128xf32> to vector<32x128xbf16>
    %c0_17 = arith.constant 0 : index
    %c0_18 = arith.constant 0 : index
    %20 = vector.load %arg9[%c0_17, %c0_18] : memref<128x128xbf16, #tpu.memory_space<vmem>>, vector<128x128xbf16>
    %cst_19 = arith.constant dense<0.000000e+00> : vector<32x128xf32>
    %21 = tpu.matmul %19, %20, %cst_19 {dimension_numbers = #tpu.dot_dimension_numbers<[1], [0], [0], [1], [0, 0, 1, 1], [], []>} : vector<32x128xbf16>, vector<128x128xbf16>, vector<32x128xf32> -> vector<32x128xf32>
    %c0_20 = arith.constant 0 : index
    %c0_21 = arith.constant 0 : index
    %22 = vector.load %arg10[%c0_20, %c0_21] : memref<1x128xf32, #tpu.memory_space<vmem>>, vector<1x128xf32>
    %23 = vector.broadcast %22 : vector<1x128xf32> to vector<32x128xf32>
    %24 = arith.addf %21, %23 : vector<32x128xf32>
    %c0_22 = arith.constant 0 : index
    %c0_23 = arith.constant 0 : index
    %25 = vector.load %arg15[%c0_22, %c0_23] : memref<64x128xbf16, #tpu.memory_space<vmem>>, vector<64x128xbf16>
    %26 = vector.shape_cast %17 : vector<32x128xf32> to vector<4x8x128xf32>
    %27 = arith.truncf %26 : vector<4x8x128xf32> to vector<4x8x128xbf16>
    %28 = tpu.concatenate %27, %27, %27, %27, %27, %27, %27, %27 in 1 : vector<4x8x128xbf16>, vector<4x8x128xbf16>, vector<4x8x128xbf16>, vector<4x8x128xbf16>, vector<4x8x128xbf16>, vector<4x8x128xbf16>, vector<4x8x128xbf16>, vector<4x8x128xbf16> -> vector<4x64x128xbf16>
    %29 = vector.shape_cast %25 : vector<64x128xbf16> to vector<1x64x128xbf16>
    %30 = vector.broadcast %29 : vector<1x64x128xbf16> to vector<4x64x128xbf16>
    %31 = arith.mulf %28, %30 : vector<4x64x128xbf16>
    %32 = vector.shape_cast %24 : vector<32x128xf32> to vector<4x8x128xf32>
    %33 = arith.truncf %32 : vector<4x8x128xf32> to vector<4x8x128xbf16>
    %34 = tpu.concatenate %33, %33, %33, %33, %33, %33, %33, %33 in 1 : vector<4x8x128xbf16>, vector<4x8x128xbf16>, vector<4x8x128xbf16>, vector<4x8x128xbf16>, vector<4x8x128xbf16>, vector<4x8x128xbf16>, vector<4x8x128xbf16>, vector<4x8x128xbf16> -> vector<4x64x128xbf16>
    %35 = vector.shape_cast %25 : vector<64x128xbf16> to vector<1x64x128xbf16>
    %36 = vector.broadcast %35 : vector<1x64x128xbf16> to vector<4x64x128xbf16>
    %37 = arith.mulf %34, %36 : vector<4x64x128xbf16>
    %38 = vector.shape_cast %10 : vector<64x128xf32> to vector<4x16x128xf32>
    %39 = arith.truncf %38 : vector<4x16x128xf32> to vector<4x16x128xbf16>
    "tpu.trace_start"() <{level = 10 : i32, message = "bld,bed->ble"}> : () -> ()
    %cst_24 = arith.constant dense<0.000000e+00> : vector<4x16x64xf32>
    %40 = tpu.matmul %39, %31, %cst_24 {dimension_numbers = #tpu.dot_dimension_numbers<[2], [2], [1], [1], [0, 0, 0, 1, 1, 1], [0], [0]>} : vector<4x16x128xbf16>, vector<4x64x128xbf16>, vector<4x16x64xf32> -> vector<4x16x64xf32>
    "tpu.trace_stop"() : () -> ()
    %cst_25 = arith.constant 2.500000e-01 : f32
    %41 = vector.broadcast %cst_25 : f32 to vector<4x16x64xf32>
    %42 = arith.mulf %40, %41 : vector<4x16x64xf32>
    %c0_26 = arith.constant 0 : index
    %c0_27 = arith.constant 0 : index
    %c0_28 = arith.constant 0 : index
    %43 = vector.load %arg4[%c0_26, %c0_27, %c0_28] : memref<4x1x64xf32, #tpu.memory_space<vmem>>, vector<4x1x64xf32>
    %44 = vector.broadcast %43 : vector<4x1x64xf32> to vector<4x16x64xf32>
    %45 = arith.addf %42, %44 : vector<4x16x64xf32>
    %cst_29 = arith.constant dense<0xFF800000> : vector<4x16xf32>
    %46 = vector.multi_reduction <maximumf>, %45, %cst_29 [2] : vector<4x16x64xf32> to vector<4x16xf32>
    %47 = vector.shape_cast %46 : vector<4x16xf32> to vector<4x16x1xf32>
    %48 = vector.broadcast %47 : vector<4x16x1xf32> to vector<4x16x64xf32>
    %49 = arith.subf %45, %48 : vector<4x16x64xf32>
    %50 = math.exp %49 : vector<4x16x64xf32>
    %51 = vector.shape_cast %50 : vector<4x16x64xf32> to vector<64x64xf32>
    %c0_30 = arith.constant 0 : index
    %c0_31 = arith.constant 0 : index
    %52 = vector.load %arg16[%c0_30, %c0_31] : memref<64x64xf32, #tpu.memory_space<vmem>>, vector<64x64xf32>
    %cst_32 = arith.constant dense<0.000000e+00> : vector<64x64xf32>
    %53 = tpu.matmul %51, %52, %cst_32 {dimension_numbers = #tpu.dot_dimension_numbers<[1], [0], [0], [1], [0, 0, 1, 1], [], []>} : vector<64x64xf32>, vector<64x64xf32>, vector<64x64xf32> -> vector<64x64xf32>
    %54 = vector.shape_cast %53 : vector<64x64xf32> to vector<4x16x64xf32>
    %55 = tpu.reciprocal %54 {approx = true} : vector<4x16x64xf32> -> vector<4x16x64xf32>
    %56 = arith.mulf %50, %55 : vector<4x16x64xf32>
    %57 = arith.truncf %56 : vector<4x16x64xf32> to vector<4x16x64xbf16>
    "tpu.trace_start"() <{level = 10 : i32, message = "ble,bed->bld"}> : () -> ()
    %cst_33 = arith.constant dense<0.000000e+00> : vector<4x16x128xf32>
    %58 = tpu.matmul %57, %37, %cst_33 {dimension_numbers = #tpu.dot_dimension_numbers<[2], [1], [1], [2], [0, 0, 0, 1, 1, 2], [0], [0]>} : vector<4x16x64xbf16>, vector<4x64x128xbf16>, vector<4x16x128xf32> -> vector<4x16x128xf32>
    "tpu.trace_stop"() : () -> ()
    %59 = vector.shape_cast %58 : vector<4x16x128xf32> to vector<64x128xf32>
    %60 = arith.truncf %59 : vector<64x128xf32> to vector<64x128xbf16>
    %c0_34 = arith.constant 0 : index
    %c0_35 = arith.constant 0 : index
    %61 = vector.load %arg11[%c0_34, %c0_35] : memref<128x128xbf16, #tpu.memory_space<vmem>>, vector<128x128xbf16>
    %cst_36 = arith.constant dense<0.000000e+00> : vector<64x128xf32>
    %62 = tpu.matmul %60, %61, %cst_36 {dimension_numbers = #tpu.dot_dimension_numbers<[1], [0], [0], [1], [0, 0, 1, 1], [], []>} : vector<64x128xbf16>, vector<128x128xbf16>, vector<64x128xf32> -> vector<64x128xf32>
    %c0_37 = arith.constant 0 : index
    %c0_38 = arith.constant 0 : index
    %63 = vector.load %arg12[%c0_37, %c0_38] : memref<1x128xf32, #tpu.memory_space<vmem>>, vector<1x128xf32>
    %64 = vector.broadcast %63 : vector<1x128xf32> to vector<64x128xf32>
    %65 = arith.addf %62, %64 : vector<64x128xf32>
    %66 = arith.addf %4, %65 : vector<64x128xf32>
    %cst_39 = arith.constant dense<0.000000e+00> : vector<64xf32>
    %67 = vector.multi_reduction <add>, %66, %cst_39 [1] : vector<64x128xf32> to vector<64xf32>
    %68 = vector.shape_cast %67 : vector<64xf32> to vector<64x1xf32>
    %cst_40 = arith.constant 1.280000e+02 : f32
    %69 = vector.broadcast %cst_40 : f32 to vector<64x1xf32>
    %70 = arith.divf %68, %69 : vector<64x1xf32>
    %71 = vector.broadcast %70 : vector<64x1xf32> to vector<64x128xf32>
    %72 = arith.subf %66, %71 : vector<64x128xf32>
    %73 = arith.mulf %72, %72 : vector<64x128xf32>
    %cst_41 = arith.constant dense<0.000000e+00> : vector<64xf32>
    %74 = vector.multi_reduction <add>, %73, %cst_41 [1] : vector<64x128xf32> to vector<64xf32>
    %75 = vector.shape_cast %74 : vector<64xf32> to vector<64x1xf32>
    %cst_42 = arith.constant 1.280000e+02 : f32
    %76 = vector.broadcast %cst_42 : f32 to vector<64x1xf32>
    %77 = arith.divf %75, %76 : vector<64x1xf32>
    %cst_43 = arith.constant 9.99999974E-6 : f32
    %78 = vector.broadcast %cst_43 : f32 to vector<64x1xf32>
    %79 = arith.addf %77, %78 : vector<64x1xf32>
    %80 = math.rsqrt %79 : vector<64x1xf32>
    %81 = vector.broadcast %80 : vector<64x1xf32> to vector<64x128xf32>
    %82 = arith.mulf %72, %81 : vector<64x128xf32>
    %c0_44 = arith.constant 0 : index
    %c0_45 = arith.constant 0 : index
    %83 = vector.load %arg13[%c0_44, %c0_45] : memref<1x128xf32, #tpu.memory_space<vmem>>, vector<1x128xf32>
    %84 = vector.broadcast %83 : vector<1x128xf32> to vector<64x128xf32>
    %85 = arith.mulf %82, %84 : vector<64x128xf32>
    %c0_46 = arith.constant 0 : index
    %c0_47 = arith.constant 0 : index
    %86 = vector.load %arg14[%c0_46, %c0_47] : memref<1x128xf32, #tpu.memory_space<vmem>>, vector<1x128xf32>
    %87 = vector.broadcast %86 : vector<1x128xf32> to vector<64x128xf32>
    %88 = arith.addf %85, %87 : vector<64x128xf32>
    %89 = vector.shape_cast %88 : vector<64x128xf32> to vector<4x16x128xf32>
    %c0_48 = arith.constant 0 : index
    %c0_49 = arith.constant 0 : index
    %c0_50 = arith.constant 0 : index
    %90 = vector.load %arg17[%c0_48, %c0_49, %c0_50] : memref<4x16x128xf32, #tpu.memory_space<vmem>>, vector<4x16x128xf32>
    tpu.vector_store %arg17[%c0_48, %c0_49, %c0_50], %89 {strides = array<i32>} : memref<4x16x128xf32, #tpu.memory_space<vmem>>, vector<4x16x128xf32>,
    return
  }
  func.func @transform_0(%arg0: i32) -> (i32, i32, i32) {
    %c0_i32 = arith.constant 0 : i32
    %c0_i32_0 = arith.constant 0 : i32
    %c0_i32_1 = arith.constant 0 : i32
    return %arg0, %c0_i32, %c0_i32_0 : i32, i32, i32
  }
  func.func @transform_1(%arg0: i32) -> (i32, i32, i32) {
    %c0_i32 = arith.constant 0 : i32
    %c0_i32_0 = arith.constant 0 : i32
    %c0_i32_1 = arith.constant 0 : i32
    return %arg0, %c0_i32, %c0_i32_0 : i32, i32, i32
  }
  func.func @transform_2(%arg0: i32) -> (i32, i32, i32) {
    %c0_i32 = arith.constant 0 : i32
    %c0_i32_0 = arith.constant 0 : i32
    %c0_i32_1 = arith.constant 0 : i32
    return %arg0, %c0_i32, %c0_i32_0 : i32, i32, i32
  }
  func.func @transform_3(%arg0: i32) -> (i32, i32, i32) {
    %c0_i32 = arith.constant 0 : i32
    %c0_i32_0 = arith.constant 0 : i32
    %c0_i32_1 = arith.constant 0 : i32
    return %arg0, %c0_i32, %c0_i32_0 : i32, i32, i32
  }
  func.func @transform_4(%arg0: i32) -> (i32, i32) {
    %c0_i32 = arith.constant 0 : i32
    %c0_i32_0 = arith.constant 0 : i32
    %c0_i32_1 = arith.constant 0 : i32
    return %c0_i32, %c0_i32_0 : i32, i32
  }
  func.func @transform_5(%arg0: i32) -> (i32, i32) {
    %c0_i32 = arith.constant 0 : i32
    %c0_i32_0 = arith.constant 0 : i32
    %c0_i32_1 = arith.constant 0 : i32
    return %c0_i32, %c0_i32_0 : i32, i32
  }
  func.func @transform_6(%arg0: i32) -> (i32, i32) {
    %c0_i32 = arith.constant 0 : i32
    %c0_i32_0 = arith.constant 0 : i32
    %c0_i32_1 = arith.constant 0 : i32
    return %c0_i32, %c0_i32_0 : i32, i32
  }
  func.func @transform_7(%arg0: i32) -> (i32, i32) {
    %c0_i32 = arith.constant 0 : i32
    %c0_i32_0 = arith.constant 0 : i32
    %c0_i32_1 = arith.constant 0 : i32
    return %c0_i32, %c0_i32_0 : i32, i32
  }
  func.func @transform_8(%arg0: i32) -> (i32, i32) {
    %c0_i32 = arith.constant 0 : i32
    %c0_i32_0 = arith.constant 0 : i32
    %c0_i32_1 = arith.constant 0 : i32
    return %c0_i32, %c0_i32_0 : i32, i32
  }
  func.func @transform_9(%arg0: i32) -> (i32, i32) {
    %c0_i32 = arith.constant 0 : i32
    %c0_i32_0 = arith.constant 0 : i32
    %c0_i32_1 = arith.constant 0 : i32
    return %c0_i32, %c0_i32_0 : i32, i32
  }
  func.func @transform_10(%arg0: i32) -> (i32, i32) {
    %c0_i32 = arith.constant 0 : i32
    %c0_i32_0 = arith.constant 0 : i32
    %c0_i32_1 = arith.constant 0 : i32
    return %c0_i32, %c0_i32_0 : i32, i32
  }
  func.func @transform_11(%arg0: i32) -> (i32, i32) {
    %c0_i32 = arith.constant 0 : i32
    %c0_i32_0 = arith.constant 0 : i32
    %c0_i32_1 = arith.constant 0 : i32
    return %c0_i32, %c0_i32_0 : i32, i32
  }
  func.func @transform_12(%arg0: i32) -> (i32, i32) {
    %c0_i32 = arith.constant 0 : i32
    %c0_i32_0 = arith.constant 0 : i32
    %c0_i32_1 = arith.constant 0 : i32
    return %c0_i32, %c0_i32_0 : i32, i32
  }
  func.func @transform_13(%arg0: i32) -> (i32, i32) {
    %c0_i32 = arith.constant 0 : i32
    %c0_i32_0 = arith.constant 0 : i32
    %c0_i32_1 = arith.constant 0 : i32
    return %c0_i32, %c0_i32_0 : i32, i32
  }
  func.func @transform_14(%arg0: i32) -> (i32, i32) {
    %c0_i32 = arith.constant 0 : i32
    %c0_i32_0 = arith.constant 0 : i32
    %c0_i32_1 = arith.constant 0 : i32
    return %c0_i32, %c0_i32_0 : i32, i32
  }
  func.func @transform_15(%arg0: i32) -> (i32, i32) {
    %c0_i32 = arith.constant 0 : i32
    %c0_i32_0 = arith.constant 0 : i32
    %c0_i32_1 = arith.constant 0 : i32
    return %c0_i32, %c0_i32_0 : i32, i32
  }
  func.func @transform_16(%arg0: i32) -> (i32, i32, i32) {
    %c0_i32 = arith.constant 0 : i32
    %c0_i32_0 = arith.constant 0 : i32
    %c0_i32_1 = arith.constant 0 : i32
    return %arg0, %c0_i32, %c0_i32_0 : i32, i32, i32
  }
}

</mosaic_0001>

<bundles_post_ra>
// kernel: tpu_custom_call.1
= control target key start
LH: loop header
LB: loop body
LE: loop exit
PB: predicated region body
PF: predicated region fallthrough
CT: control target
= control target key end

     0   :  { %s4071_s0 = inlined_call_operand.hbm [shape: f32[8,16,128], index: 0, kind: input, shape index: {}]   ;;  %s4072_s1 = inlined_call_operand.hbm [shape: f32[8,8,128], index: 1, kind: input, shape index: {}]   ;;  %s4073_s2 = inlined_call_operand.hbm [shape: f32[8,8,128], index: 2, kind: input, shape index: {}]   ;;  %s4074_s3 = inlined_call_operand.vmem [shape: f32[8,1,64], index: 3, kind: input, shape index: {}]   ;;  %s4075_s4 = inlined_call_operand.hbm [shape: bf16[128,128], index: 4, kind: input, shape index: {}]   ;;  %s4076_s5 = inlined_call_operand.vmem [shape: f32[1,128], index: 5, kind: input, shape index: {}]   ;;  %s4077_s6 = inlined_call_operand.hbm [shape: bf16[128,128], index: 6, kind: input, shape index: {}]   ;;  %s4078_s7 = inlined_call_operand.vmem [shape: f32[1,128], index: 7, kind: input, shape index: {}]   ;;  %s4079_s8 = inlined_call_operand.hbm [shape: bf16[128,128], index: 8, kind: input, shape index: {}]   ;;  %s4080_s9 = inlined_call_operand.vmem [shape: f32[1,128], index: 9, kind: input, shape index: {}]   ;;  %s4081_s10 = inlined_call_operand.hbm [shape: bf16[128,128], index: 10, kind: input, shape index: {}]   ;;  %s4082_s11 = inlined_call_operand.vmem [shape: f32[1,128], index: 11, kind: input, shape index: {}]   ;;  %s4083_s12 = inlined_call_operand.vmem [shape: f32[1,128], index: 12, kind: input, shape index: {}]   ;;  %s4084_s13 = inlined_call_operand.vmem [shape: f32[1,128], index: 13, kind: input, shape index: {}]   ;;  %s4085_s14 = inlined_call_operand.vmem [shape: bf16[64,128], index: 14, kind: input, shape index: {}]   ;;  %s4086_s15 = inlined_call_operand.hbm [shape: f32[64,64], index: 15, kind: input, shape index: {}]   ;;  %s4087_s16 = inlined_call_operand.hbm [shape: f32[8,16,128], index: 16, kind: output, shape index: {}]  }
   0x1   :  { %4122 = sst [smem:[#allocation30_spill]] %s4071_s0 }
   0x2   :  { %4123 = sst [smem:[#allocation31_spill]] %s4072_s1 }
   0x3   :  { %4124 = sst [smem:[#allocation32_spill]] %s4074_s3 }
   0x4   :  { %4125 = sst [smem:[#allocation33_spill]] %s4075_s4 }
   0x5   :  { %4126 = sst [smem:[#allocation34_spill]] %s4076_s5 }
   0x6   :  { %4127 = sst [smem:[#allocation35_spill]] %s4078_s7 }
   0x7   :  { %4128 = sst [smem:[#allocation36_spill]] %s4079_s8 }
   0x8   :  { %4129 = sst [smem:[#allocation37_spill]] %s4080_s9 }
   0x9   :  { %4130 = sst [smem:[#allocation38_spill]] %s4082_s11 }
   0xa   :  { %4131 = sst [smem:[#allocation39_spill]] %s4083_s12 }
   0xb   :  { %4132 = sst [smem:[#allocation40_spill]] %s4084_s13 }
   0xc   :  { %4133 = sst [smem:[#allocation41_spill]] %s4085_s14 }
   0xd   :  { %4134 = sst [smem:[#allocation42_spill]] %s4087_s16 }
   0xe   :  { %21 = vsyncpa [#allocation3], 0 }
   0xf   :  { %23 = vsyncpa [#allocation3 + $0x1], 0 }
  0x10   :  { %24 = vsyncpa [#allocation6], 0 }
  0x11   :  { %26 = vsyncpa [#allocation6 + $0x1], 0 }
  0x12   :  { %27 = vsyncpa [#allocation9], 0 }
  0x13   :  { %28 = vsyncpa [#allocation12], 0 }
  0x14   :  { %29 = vsyncpa [#allocation15], 0 }
  0x15   :  { %30 = vsyncpa [#allocation4], 0 }
  0x16   :  { %32 = vsyncpa [#allocation4 + $0x1], 0  ;;  %s3341_s21 = smov 0   ;;  %s3343_s22 = smov 0  }
  0x17   :  { %s3345_s23 = smov 0   ;;  %s3347_s24 = smov 0  }
  0x18 LB: > { %4135 = sst [smem:[#allocation23_spill]] %s3225_s21  ;;  %s3239_s25 = smov [#allocation8]   ;;  %s3237_s24 = sphi %s3347_s24, %s4190_s24   ;;  %s3233_s23 = sphi %s3345_s23, %s4192_s23   ;;  %s3229_s22 = sphi %s3343_s22, %s4194_s22   ;;  %s3225_s21 = sphi %s3341_s21, %s4193_s21  }
  0x19   : > { %4136 = sst [smem:[#allocation24_spill]] %s3233_s23  ;;  %s437_s26 = sshll.u32 %s3239_s25, 4  ;;  %s3368_s26 = int_to_ptr.vmem [resolvable:$true] %s437_s26 }
  0x1a   : > { %s3362_s27 = sadd.s32 4294967295, %s3237_s24   ;;  %p2298_p0 = scmp.ge.s32.totalorder %s3237_s24, 1 }
  0x1b   : > { %4137 = sst [smem:[#allocation25_spill]] %s3362_s27  ;;  %p4090_p1 = scmp.eq.s32.totalorder %s3362_s27, 0 }
  0x1c   : > { %p412_p2 = scmp.eq.s32.totalorder %s3362_s27, 1  ;;  %p425_p3 = scmp.lt.s32.totalorder %s3237_s24, 3 }
  0x1d   : > { %s3240_s29 = smov [#allocation11]   ;;  %s4140_s4 = sld [smem:[#allocation33_spill]] }
  0x1e   : > { %p3370_p4 = pnand %p2298_p0, %p425_p3  ;;  %s469_s30 = sshll.u32 %s3240_s29, 4  ;;  %s3377_s30 = int_to_ptr.vmem [resolvable:$true] %s469_s30 }
  0x20   : > { %s4138_s28 = scalar_select %p3370_p4, 1, 0 }
  0x21   : > { %p2752_p6 = pneg %p3370_p4 }
  0x23   : > { %p3381_p7 = pnand %p2752_p6, %p4090_p1  ;;  %s2925_s19 = scalar_lea.hbm %s4140_s4, 1024 }
  0x24   : > { %p2926_p8 = scmp.ne.s32.totalorder %s4140_s4, %s2925_s19  ;;  %p2932_p12 = scmp.lt.u32.totalorder %s2925_s19, %s4140_s4 }
  0x25   : > { %s4139_s0 = scalar_select %p3381_p7, 1, 0 }
  0x26   : > { %p3393_p9 = pneg %p3381_p7 }
  0x28   : > { %s4141_s16 = scalar_select %p3393_p9, 1, 0 }
  0x29   : > { %p2928_p10 = pnand %p3393_p9, %p2926_p8 }
  0x2b   : > { %p2929_p11 = pneg %p2928_p10 }
  0x2d   : > { %p2934_p13 = pnand %p2932_p12, %p2929_p11 }
  0x2f   : > { %2937 = shalt.err (!%p2934_p13)
}
  0x30   : > { %s2938_s17 = scalar_lea.vmem %s3368_s26, 1024  ;;  %p2946_p5 = scmp.lt.s32.totalorder %s3368_s26, %s3368_s26 }
  0x31   : > { %p2939_p0 = scmp.ne.s32.totalorder %s3368_s26, %s2938_s17  ;;  %p2947_p1 = scmp.lt.s32.totalorder %s2938_s17, %s2938_s17 }
  0x33   : > { %p2941_p3 = pnand %p2939_p0, %p3393_p9  ;;  %p2948_p8 = por %p2947_p1, %p2946_p5 }
  0x35   : > { %p2942_p6 = pneg %p2941_p3 }
  0x37   : > { %p2949_p10 = pnand %p2948_p8, %p2942_p6 }
  0x39   : > { %2952 = shalt.err (!%p2949_p10)
}
  0x3a   : > { %s4092_s18 = smov 64   ;;  %s4094_s13 = smov 4  }
  0x3b   : > { %2755 = dma.hbm_to_vmem [thread:$0]  (!%p3381_p7), %s4140_s4, 1024, %s3368_s26, [#allocation9], %s4092_s18, %s4092_s18, %s4094_s13  }
  0x3c   : > { %s4142_s8 = sld [smem:[#allocation36_spill]] }
  0x42   : > { %s2953_s17 = scalar_lea.hbm %s4142_s8, 1024 }
  0x43   : > { %p2954_p1 = scmp.ne.s32.totalorder %s4142_s8, %s2953_s17  ;;  %p2960_p12 = scmp.lt.u32.totalorder %s2953_s17, %s4142_s8 }
  0x45   : > { %p2956_p5 = pnand %p2954_p1, %p3393_p9 }
  0x47   : > { %p2957_p11 = pneg %p2956_p5 }
  0x49   : > { %p2962_p13 = pnand %p2960_p12, %p2957_p11 }
  0x4b   : > { %2965 = shalt.err (!%p2962_p13)
}
  0x4c   : > { %s2966_s26 = scalar_lea.vmem %s3377_s30, 1024  ;;  %p2974_p8 = scmp.lt.s32.totalorder %s3377_s30, %s3377_s30 }
  0x4d   : > { %p2967_p0 = scmp.ne.s32.totalorder %s3377_s30, %s2966_s26  ;;  %p2975_p10 = scmp.lt.s32.totalorder %s2966_s26, %s2966_s26 }
  0x4f   : > { %p2969_p3 = pnand %p2967_p0, %p3393_p9  ;;  %p2976_p1 = por %p2975_p10, %p2974_p8 }
  0x51   : > { %p2970_p6 = pneg %p2969_p3 }
  0x53   : > { %p2977_p5 = pnand %p2976_p1, %p2970_p6 }
  0x55   : > { %2980 = shalt.err (!%p2977_p5)
}
  0x56   : > { %2761 = dma.hbm_to_vmem [thread:$0]  (!%p3381_p7), %s4142_s8, 1024, %s3377_s30, [#allocation12], %s4092_s18, %s4092_s18, %s4094_s13  }
  0x57   : > { %s2297_s11 = sadd.s32 4294967294, %s3237_s24   ;;  %s3445_s12 = sadd.s32 1, %s3237_s24  }
  0x58   : > { %4143 = sst [smem:[#allocation26_spill]] %s3445_s12  ;;  %s45_s19 = sadd.s32 1, %s3233_s23 }
  0x59   : > { %s42_s20 = ssub.s32 %s3237_s24, %s3445_s12  ;;  %p52_p11 = scmp.ne.s32.totalorder %s3233_s23, %s3229_s22 }
  0x5a   : > { %p43_p12 = scmp.eq.s32.totalorder %s42_s20, 0  ;;  %p53_p13 = scmp.eq.s32.totalorder %s3237_s24, 0 }
  0x5b   : > { %p58_p0 = scmp.ne.s32.totalorder %s3229_s22, %s3225_s21  ;;  %p3457_p3 = por %p412_p2, %p52_p11 }
  0x5c   : > { %s3462_s30 = scalar_select %p43_p12, %s3233_s23, %s45_s19  }
  0x5d   : > { %s4144_s25 = scalar_select %p3457_p3, 1, 0 }
  0x5e   : > { %4146 = sst [smem:[#allocation28_spill]] %s3462_s30  ;;  %p54_p6 = por %p53_p13, %p52_p11 }
  0x5f   : > { %4145 = sst [smem:[#allocation27_spill]] %s4144_s25  ;;  %p4147_p8 = scmp.eq.s32.totalorder %s3362_s27, 0 }
  0x60   : > { %p418_p1 = scmp.eq.s32.totalorder %s2297_s11, 1  ;;  %p2787_p5 = scmp.lt.s32.totalorder %s3237_s24, 2 }
  0x61   : > { %p3466_p10 = por %p4147_p8, %p58_p0  ;;  %s3476_s26 = sand.u32 1, %s3233_s23  }
  0x62   : > { %p3471_p4 = por %p418_p1, %p58_p0  ;;  %p3478_p2 = pnand %p2787_p5, %p54_p6 }
  0x63   : > { %s4148_s29 = scalar_select %p3466_p10, 1, 0 }
  0x64   : > { %s4149_s17 = scalar_select %p3471_p4, 1, 0 }
  0x65   : > { %s4151_s3 = scalar_select %p3478_p2, 1, 0 }
  0x66   : > { %4150 = sst [smem:[#allocation29_spill]] %s4149_s17  ;;  %s546_s9 = sand.u32 1, %s3237_s24  }
  0x67   : > { %s4097_s19 = sshll.u32 %s3476_s26, 5  ;;  %s4098_s20 = sshll.u32 %s3237_s24, 9 }
  0x68   : > { %s550_s18 = scalar_lea.vmem [#allocation5], %s4097_s19  ;;  %s4152_s1 = sld [smem:[#allocation31_spill]] }
  0x69   : > { %s557_s11 = sshll.u32 %s550_s18, 4  ;;  %s3496_s30 = scalar_lea.sflag [#allocation6], %s546_s9  ;;  %s3494_s11 = int_to_ptr.vmem [resolvable:$true] %s557_s11 }
  0x6a   : > { %p3502_p12 = pneg %p3478_p2 }
  0x6c   : > { %s4153_s19 = scalar_select %p3502_p12, 1, 0 }
  0x6e   : > { %s3492_s8 = scalar_lea.hbm %s4152_s1, %s4098_s20  ;;  %s2986_s13 = scalar_lea.hbm %s4152_s1, 1024 }
  0x6f   : > { %s2981_s23 = scalar_lea.hbm %s3492_s8, 512  ;;  %p2987_p6 = scmp.lt.u32.totalorder %s3492_s8, %s4152_s1 }
  0x70   : > { %p2982_p11 = scmp.ne.s32.totalorder %s3492_s8, %s2981_s23  ;;  %p2988_p8 = scmp.lt.u32.totalorder %s2986_s13, %s2981_s23 }
  0x71   : > { %p2990_p5 = scmp.lt.u32.totalorder %s2981_s23, %s3492_s8 }
  0x72   : > { %p2984_p13 = pnand %p3502_p12, %p2982_p11  ;;  %p2989_p1 = por %p2988_p8, %p2987_p6 }
  0x74   : > { %p2985_p0 = pneg %p2984_p13  ;;  %p2991_p4 = por %p2990_p5, %p2989_p1 }
  0x76   : > { %p2992_p3 = pnand %p2991_p4, %p2985_p0 }
  0x78   : > { %2995 = shalt.err (!%p2992_p3)
}
  0x79   : > { %s2996_s9 = scalar_lea.vmem %s3494_s11, 512  ;;  %s3243_s4 = smov [#allocation5]  }
  0x7a   : > { %p2997_p11 = scmp.ne.s32.totalorder %s3494_s11, %s2996_s9  ;;  %s3001_s18 = sshll.u32 %s3243_s4, 4  ;;  %s3002_s18 = int_to_ptr.vmem [resolvable:$false] %s3001_s18 }
  0x7b   : > { %s3003_s12 = scalar_lea.vmem %s3002_s18, 1024  ;;  %p3004_p7 = scmp.lt.s32.totalorder %s3494_s11, %s3002_s18 }
  0x7c   : > { %p2999_p13 = pnand %p2997_p11, %p3502_p12  ;;  %p3005_p9 = scmp.lt.s32.totalorder %s3003_s12, %s2996_s9 }
  0x7e   : > { %p3000_p10 = pneg %p2999_p13  ;;  %p3006_p6 = por %p3005_p9, %p3004_p7 }
  0x80   : > { %p3007_p8 = pnand %p3006_p6, %p3000_p10 }
  0x82   : > { %3010 = shalt.err (!%p3007_p8)
}
  0x83   : > { %s4116_s23 = smov 128   ;;  %s4118_s20 = smov 8  }
  0x84   : > { %2774 = dma.hbm_to_vmem [thread:$0]  (!%p3478_p2), %s3492_s8, 512, %s3494_s11, %s3496_s30, %s4116_s23, %s4116_s23, %s4118_s20  }
  0x85   : > { %s4154_s13 = sshll.u32 %s3237_s24, 9  ;;  %s4155_s12 = sshll.u32 %s3476_s26, 5 }
  0x86   : > { %s3534_s18 = scalar_lea.hbm %s4073_s2, %s4154_s13  ;;  %s3538_s1 = scalar_lea.vmem [#allocation7], %s4155_s12 }
  0x87   : > { %s3246_s21 = smov [#allocation10]   ;;  %s3011_s7 = scalar_lea.hbm %s4077_s6, 1024 }
  0x88   : > { %s453_s25 = sshll.u32 %s3246_s21, 4  ;;  %p3012_p4 = scmp.ne.s32.totalorder %s4077_s6, %s3011_s7  ;;  %s454_s25 = int_to_ptr.vmem [resolvable:$true] %s453_s25 }
  0x89   : > { %p4156_p7 = scmp.ne.s32.totalorder %s4141_s16, 0  ;;  %p3018_p10 = scmp.lt.u32.totalorder %s3011_s7, %s4077_s6 }
  0x8b   : > { %p3014_p9 = pnand %p3012_p4, %p4156_p7 }
  0x8d   : > { %p3015_p3 = pneg %p3014_p9 }
  0x8f   : > { %p3020_p0 = pnand %p3018_p10, %p3015_p3 }
  0x91   : > { %3023 = shalt.err (!%p3020_p0)
}
  0x92   : > { %s3024_s4 = scalar_lea.vmem %s454_s25, 1024  ;;  %p3032_p13 = scmp.lt.s32.totalorder %s454_s25, %s454_s25 }
  0x93   : > { %p3025_p1 = scmp.ne.s32.totalorder %s454_s25, %s3024_s4  ;;  %p3033_p6 = scmp.lt.s32.totalorder %s3024_s4, %s3024_s4 }
  0x95   : > { %p3027_p5 = pnand %p3025_p1, %p4156_p7  ;;  %p3034_p8 = por %p3033_p6, %p3032_p13 }
  0x97   : > { %p3028_p11 = pneg %p3027_p5 }
  0x99   : > { %p3035_p2 = pnand %p3034_p8, %p3028_p11 }
  0x9b   : > { %3038 = shalt.err (!%p3035_p2)
}
  0x9c   : > { %p4157_p4 = scmp.ne.s32.totalorder %s4139_s0, 0  ;;  %s4158_s5 = smov 4  }
  0x9d   : > { %s4159_s14 = smov 64   ;;  %s3247_s27 = smov [#allocation13]  }
  0x9e   : > { %2758 = dma.hbm_to_vmem [thread:$0]  (!%p4157_p4), %s4077_s6, 1024, %s454_s25, [#allocation9], %s4159_s14, %s4159_s14, %s4158_s5  }
  0x9f   : > { %s485_s9 = sshll.u32 %s3247_s27, 4  ;;  %s3248_s12 = smov [#allocation14]   ;;  %s486_s9 = int_to_ptr.vmem [resolvable:$true] %s485_s9 }
  0xa0   : > { %s510_s8 = sshll.u32 %s3248_s12, 4  ;;  %s3039_s4 = scalar_lea.hbm %s4081_s10, 1024  ;;  %s511_s8 = int_to_ptr.vmem [resolvable:$true] %s510_s8 }
  0xa1   : > { %p3040_p2 = scmp.ne.s32.totalorder %s4081_s10, %s3039_s4  ;;  %p3046_p10 = scmp.lt.u32.totalorder %s3039_s4, %s4081_s10 }
  0xa3   : > { %p3042_p9 = pnand %p3040_p2, %p4156_p7 }
  0xa5   : > { %p3043_p3 = pneg %p3042_p9 }
  0xa7   : > { %p3048_p0 = pnand %p3046_p10, %p3043_p3 }
  0xa9   : > { %3051 = shalt.err (!%p3048_p0)
}
  0xaa   : > { %s3052_s25 = scalar_lea.vmem %s486_s9, 1024  ;;  %p3060_p13 = scmp.lt.s32.totalorder %s486_s9, %s486_s9 }
  0xab   : > { %p3053_p1 = scmp.ne.s32.totalorder %s486_s9, %s3052_s25  ;;  %p3061_p6 = scmp.lt.s32.totalorder %s3052_s25, %s3052_s25 }
  0xad   : > { %p3055_p5 = pnand %p3053_p1, %p4156_p7  ;;  %p3062_p8 = por %p3061_p6, %p3060_p13 }
  0xaf   : > { %p3056_p11 = pneg %p3055_p5 }
  0xb1   : > { %p3063_p12 = pnand %p3062_p8, %p3056_p11 }
  0xb3   : > { %3066 = shalt.err (!%p3063_p12)
}
  0xb4   : > { %2764 = dma.hbm_to_vmem [thread:$0]  (!%p4157_p4), %s4081_s10, 1024, %s486_s9, [#allocation12], %s4159_s14, %s4159_s14, %s4158_s5  }
  0xb5   : > { %s3067_s27 = scalar_lea.hbm %s4086_s15, 1024 }
  0xb6   : > { %p3068_p2 = scmp.ne.s32.totalorder %s4086_s15, %s3067_s27  ;;  %p3074_p3 = scmp.lt.u32.totalorder %s3067_s27, %s4086_s15 }
  0xb8   : > { %p3070_p12 = pnand %p3068_p2, %p4156_p7 }
  0xba   : > { %p3071_p9 = pneg %p3070_p12 }
  0xbc   : > { %p3076_p10 = pnand %p3074_p3, %p3071_p9 }
  0xbe   : > { %3079 = shalt.err (!%p3076_p10)
}
  0xbf   : > { %s3080_s21 = scalar_lea.vmem %s511_s8, 1024  ;;  %p3088_p11 = scmp.lt.s32.totalorder %s511_s8, %s511_s8 }
  0xc0   : > { %p3081_p0 = scmp.ne.s32.totalorder %s511_s8, %s3080_s21  ;;  %p3089_p13 = scmp.lt.s32.totalorder %s3080_s21, %s3080_s21 }
  0xc2   : > { %p3083_p1 = pnand %p3081_p0, %p4156_p7  ;;  %p3090_p6 = por %p3089_p13, %p3088_p11 }
  0xc4   : > { %p3084_p5 = pneg %p3083_p1 }
  0xc6   : > { %p3091_p8 = pnand %p3090_p6, %p3084_p5 }
  0xc8   : > { %3094 = shalt.err (!%p3091_p8)
}
  0xc9   : > { %s4160_s5 = smov 8   ;;  %s4161_s14 = smov 128  }
  0xca   : > { %2767 = dma.hbm_to_vmem [thread:$0]  (!%p4157_p4), %s4086_s15, 1024, %s511_s8, [#allocation15], %s4161_s14, %s4161_s14, %s4160_s5  }
  0xcb   : > { %s2305_s16 = sshll.u32 %s3476_s26, 6  ;;  %s2391_s17 = sshll.u32 %s3237_s24, 10 }
  0xcc   : > { %s4162_s7 = sld [smem:[#allocation30_spill]]  ;;  %s4163_s0 = sshll.u32 %s3538_s1, 4  ;;  %s3613_s0 = int_to_ptr.vmem [resolvable:$true] %s4163_s0 }
  0xcd   : > { %s528_s12 = scalar_lea.vmem [#allocation2], %s2305_s16  ;;  %s525_s13 = scalar_lea.sflag [#allocation3], %s3476_s26 }
  0xce   : > { %s536_s11 = sshll.u32 %s528_s12, 4  ;;  %p4164_p4 = scmp.ne.s32.totalorder %s4153_s19, 0  ;;  %s3615_s11 = int_to_ptr.vmem [resolvable:$true] %s536_s11 }
  0xd2   : > { %s3609_s27 = scalar_lea.hbm %s4162_s7, %s2391_s17  ;;  %s3100_s1 = scalar_lea.hbm %s4162_s7, 2048 }
  0xd3   : > { %s3095_s8 = scalar_lea.hbm %s3609_s27, 1024  ;;  %p3101_p9 = scmp.lt.u32.totalorder %s3609_s27, %s4162_s7 }
  0xd4   : > { %p3096_p7 = scmp.ne.s32.totalorder %s3609_s27, %s3095_s8  ;;  %p3102_p3 = scmp.lt.u32.totalorder %s3100_s1, %s3095_s8 }
  0xd5   : > { %p3104_p0 = scmp.lt.u32.totalorder %s3095_s8, %s3609_s27 }
  0xd6   : > { %p3098_p2 = pnand %p3096_p7, %p4164_p4  ;;  %p3103_p10 = por %p3102_p3, %p3101_p9 }
  0xd8   : > { %p3099_p12 = pneg %p3098_p2  ;;  %p3105_p1 = por %p3104_p0, %p3103_p10 }
  0xda   : > { %p3106_p5 = pnand %p3105_p1, %p3099_p12 }
  0xdc   : > { %3109 = shalt.err (!%p3106_p5)
}
  0xdd   : > { %s3110_s16 = scalar_lea.vmem %s3615_s11, 1024  ;;  %s3249_s17 = smov [#allocation2]  }
  0xde   : > { %p3111_p11 = scmp.ne.s32.totalorder %s3615_s11, %s3110_s16  ;;  %s3115_s23 = sshll.u32 %s3249_s17, 4  ;;  %s3116_s23 = int_to_ptr.vmem [resolvable:$false] %s3115_s23 }
  0xdf   : > { %s3117_s20 = scalar_lea.vmem %s3116_s23, 2048  ;;  %p3118_p8 = scmp.lt.s32.totalorder %s3615_s11, %s3116_s23 }
  0xe0   : > { %p3113_p13 = pnand %p3111_p11, %p4164_p4  ;;  %p3119_p7 = scmp.lt.s32.totalorder %s3117_s20, %s3110_s16 }
  0xe2   : > { %p3114_p6 = pneg %p3113_p13  ;;  %p3120_p2 = por %p3119_p7, %p3118_p8 }
  0xe4   : > { %p3121_p9 = pnand %p3120_p2, %p3114_p6 }
  0xe6   : > { %3124 = shalt.err (!%p3121_p9)
}
  0xe7   : > { %p4165_p12 = scmp.ne.s32.totalorder %s4151_s3, 0  ;;  %s3125_s12 = scalar_lea.hbm %s3534_s18, 512 }
  0xe8   : > { %p3126_p3 = scmp.ne.s32.totalorder %s3534_s18, %s3125_s12  ;;  %s3130_s21 = scalar_lea.hbm %s4073_s2, 1024 }
  0xe9   : > { %2771 = dma.hbm_to_vmem [thread:$0]  (!%p4165_p12), %s3609_s27, 1024, %s3615_s11, %s525_s13, %s4161_s14, %s4161_s14, %s4160_s5  }
  0xea   : > { %p3128_p10 = pnand %p3126_p3, %p4164_p4  ;;  %p3131_p1 = scmp.lt.u32.totalorder %s3534_s18, %s4073_s2 }
  0xeb   : > { %p3132_p5 = scmp.lt.u32.totalorder %s3130_s21, %s3125_s12  ;;  %p3134_p13 = scmp.lt.u32.totalorder %s3125_s12, %s3534_s18 }
  0xec   : > { %p3129_p0 = pneg %p3128_p10 }
  0xed   : > { %p3133_p11 = por %p3132_p5, %p3131_p1 }
  0xef   : > { %p3135_p6 = por %p3134_p13, %p3133_p11 }
  0xf1   : > { %p3136_p8 = pnand %p3135_p6, %p3129_p0 }
  0xf3   : > { %3139 = shalt.err (!%p3136_p8)
}
  0xf4   : > { %s3140_s26 = scalar_lea.vmem %s3613_s0, 512  ;;  %s3250_s27 = smov [#allocation7]  }
  0xf5   : > { %p3141_p7 = scmp.ne.s32.totalorder %s3613_s0, %s3140_s26  ;;  %s3145_s11 = sshll.u32 %s3250_s27, 4  ;;  %s3146_s11 = int_to_ptr.vmem [resolvable:$false] %s3145_s11 }
  0xf6   : > { %s3147_s13 = scalar_lea.vmem %s3146_s11, 1024  ;;  %p3148_p3 = scmp.lt.s32.totalorder %s3613_s0, %s3146_s11 }
  0xf7   : > { %p3143_p2 = pnand %p3141_p7, %p4164_p4  ;;  %p3149_p10 = scmp.lt.s32.totalorder %s3147_s13, %s3140_s26 }
  0xf9   : > { %p3144_p9 = pneg %p3143_p2  ;;  %p3150_p1 = por %p3149_p10, %p3148_p3 }
  0xfb   : > { %p3151_p5 = pnand %p3150_p1, %p3144_p9 }
  0xfd   : > { %3154 = shalt.err (!%p3151_p5)
}
  0xfe   : > { %2777 = dma.hbm_to_vmem [thread:$0]  (!%p4165_p12), %s3534_s18, 512, %s3613_s0, %s3496_s30, %s4161_s14, %s4161_s14, %s4160_s5  }
  0xff   : > { %p4166_p4 = scmp.ne.s32.totalorder %s4138_s28, 0 }
 0x100   : > { %s3672_s19 = sand.u32 (!%p4166_p4), 1, %s3229_s22   ;;  %p4167_p0 = scmp.ne.s32.totalorder (!%p4166_p4), %s4148_s29, 0 }
 0x101   : > { %598 = sbr.rel (%p4166_p4) target bundleno = 1975 (0x7b7), region = 84  ;;  %s2316_s25 = sshll.u32 (!%p4166_p4), %s3672_s19, 6 }
 0x102   : > { %s601_s16 = scalar_lea.sflag (!%p4166_p4), [#allocation3], %s3672_s19  ;;  %s3678_s3 = scalar_lea.vmem (!%p4166_p4), [#allocation2], %s2316_s25 }
 0x108   : > { %3200 = dma.done.wait (%p4167_p0), %s601_s16, 1024  }
 0x109   : > { %3202 = vsyncadd (%p4167_p0), %s601_s16, 4294966272  ;;  %s4168_s30 = sld [smem:[#allocation25_spill]]  ;;  %s2317_s18 = sshll.u32 %s3672_s19, 5 }
 0x10a   : > { %s3686_s14 = scalar_lea.vmem [#allocation5], %s2317_s18 }
 0x10f   : > { %s609_s28 = sand.u32 1, %s4168_s30  }
 0x110   : > { %s610_s5 = scalar_lea.sflag [#allocation6], %s609_s28 }
 0x111   : > { %3204 = dma.done.wait (%p4167_p0), %s610_s5, 1024  }
 0x112   : > { %3206 = vsyncadd (%p4167_p0), %s610_s5, 4294966272  ;;  %s3692_s0 = scalar_lea.vmem [#allocation7], %s2317_s18  ;;  %p4169_p12 = scmp.eq.s32.totalorder %s4168_s30, 0 }
 0x114   : > { %3208 = dma.done.wait (%p4169_p12), [#allocation9], 2048   ;;  %p4170_p11 = pmov %p4169_p12 }
 0x116   : > { %3210 = vsyncadd (%p4170_p11), [#allocation9], 4294965248  ;;  %p4171_p13 = pmov %p4170_p11 }
 0x117   : > { %p4172_p6 = pmov %p4170_p11 }
 0x118   : > { %3212 = dma.done.wait (%p4171_p13), [#allocation12], 2048  }
 0x119   : > { %3214 = vsyncadd (%p4172_p6), [#allocation12], 4294965248  ;;  %p4173_p8 = pmov %p4172_p6 }
 0x11a   : > { %p4174_p7 = pmov %p4172_p6 }
 0x11b   : > { %3216 = dma.done.wait (%p4173_p8), [#allocation15], 1024  }
 0x11c   : > { %3218 = vsyncadd (%p4174_p7), [#allocation15], 4294966272  ;;  %v2839_v0 = vld [vmem:[#allocation10] sm:$0xff]   ;;  %v2840_v1 = vld [vmem:[#allocation10 + $0x8] sm:$0xff]   ;;  %v3251_v52 = vmov 0.0   ;;  %vm3252_vm0 = vmmov 0  }
 0x11d   : > { %2520 = vmatprep.subr.bf16.mxu1 %v2839_v0  ;;  %v2841_v2 = vld [vmem:[#allocation10 + $0x10] sm:$0xff]   ;;  %v2842_v3 = vld [vmem:[#allocation10 + $0x18] sm:$0xff]   ;;  %v3707_v4 = vld [vmem:[%s3686_s14] sm:$0xff]  ;;  %s4175_s23 = sld [smem:[#allocation35_spill]]  ;;  %vm1139_vm1 = vcmask 1043456   ;;  %s4176_s8 = sld [smem:[#allocation41_spill]] }
 0x11e   : > { %2521 = vmatpush3.bf16.msra.mxu1 %v2839_v0  ;;  %v3710_v5 = vld [vmem:[%s3686_s14 + $0x8] sm:$0xff]  ;;  %v727_v6 = vld [vmem:[%s3692_s0] sm:$0xff]  ;;  %v2849_v14 = vld [vmem:[#allocation8 + $0x10] sm:$0xff]   ;;  %s4177_s1 = sld [smem:[#allocation34_spill]]  ;;  %s4178_s5 = sld [smem:[#allocation37_spill]]  ;;  %vm1452_vm2 = vcmask 523264  }
 0x11f   : > { %2522 = vmatprep.subr.bf16.mxu1 %v2840_v1  ;;  %v728_v7 = vld [vmem:[%s3692_s0 + $0x8] sm:$0xff]  ;;  %v731_v8 = vadd.f32 %v727_v6, %v3707_v4  ;;  %v2847_v10 = vld [vmem:[#allocation8] sm:$0xff]   ;;  %v2850_v16 = vld [vmem:[#allocation8 + $0x18] sm:$0xff]   ;;  %v997_v45 = vpack.c.bf16 %v3710_v5, %v3707_v4  ;;  %s4179_s17 = sld [smem:[#allocation32_spill]]  ;;  %s4180_s4 = sld [smem:[#allocation38_spill]] }
 0x120   : > { %v732_v9 = vadd.f32 %v728_v7, %v3710_v5  ;;  %v2843_v11 = vld [vmem:[#allocation10 + $0x20] sm:$0xff]   ;;  %2496 = vmatprep.subr.bf16.mxu0 %v2847_v10  ;;  %v2848_v13 = vld [vmem:[#allocation8 + $0x8] sm:$0xff]   ;;  %v2845_v19 = vld [vmem:[#allocation10 + $0x30] sm:$0xff]   ;;  %s4182_s27 = sld [smem:[#allocation40_spill]]  ;;  %s4006_s11 = scalar_lea.vmem [#allocation16], %s2316_s25 }
 0x121   : > { %2497 = vmatpush3.bf16.msra.mxu0 %v2847_v10  ;;  %v2844_v15 = vld [vmem:[#allocation10 + $0x28] sm:$0xff]   ;;  %v715_v17 = vld [vmem:[%s3678_s3] sm:$0xff]  ;;  %v3719_v21 = vld [vmem:[%s3686_s14 + $0x10] sm:$0xff]  ;;  %s4183_s25 = sld [smem:[#allocation27_spill]]  ;;  %s2395_s13 = sshll.u32 %s4168_s30, 10 }
 0x122   : > { %2523 = vmatpush3.bf16.msra.mxu1 %v2840_v1  ;;  %v875_v12 = vpack.c.bf16 %v732_v9, %v731_v8  ;;  %2498 = vmatprep.subr.bf16.mxu0 %v2848_v13  ;;  %v716_v18 = vld [vmem:[%s3678_s3 + $0x8] sm:$0xff]  ;;  %v3722_v22 = vld [vmem:[%s3686_s14 + $0x18] sm:$0xff]  ;;  %v729_v23 = vld [vmem:[%s3692_s0 + $0x10] sm:$0xff]  ;;  %s2325_s14 = sshll.u32 %s4168_s30, 2  ;;  %s2124_s16 = sshll.u32 %s4006_s11, 4  ;;  %s4025_s16 = int_to_ptr.vmem [resolvable:$true] %s2124_s16 }
 0x123   : > { %2524 = vmatprep.subr.bf16.mxu1 %v2841_v2  ;;  %v735_v20 = vpack.c.bf16 %v716_v18, %v715_v17  ;;  %v2851_v24 = vld [vmem:[#allocation8 + $0x20] sm:$0xff]   ;;  %v730_v25 = vld [vmem:[%s3692_s0 + $0x18] sm:$0xff]  ;;  %v733_v27 = vadd.f32 %v729_v23, %v3719_v21  ;;  %v2852_v29 = vld [vmem:[#allocation8 + $0x28] sm:$0xff]   ;;  %v998_v51 = vpack.c.bf16 %v3722_v22, %v3719_v21  ;;  %p709_p2 = scmp.lt.s32.totalorder %s2325_s14, 7  ;;  %s2110_s0 = scalar_lea.sflag [#allocation4], %s3672_s19 }
 0x124   : > { %2536 = vmatprep.mubr.bf16.mxu1 %v875_v12  ;;  %v2846_v26 = vld [vmem:[#allocation10 + $0x38] sm:$0xff]   ;;  %v734_v28 = vadd.f32 %v730_v25, %v3722_v22  ;;  %v2853_v30 = vld [vmem:[#allocation8 + $0x30] sm:$0xff]   ;;  %v3735_v35 = vld [vmem:[%s3678_s3 + $0x20] sm:$0xff]  ;;  %s3155_s29 = scalar_lea.vmem %s4025_s16, 1024  ;;  %s3253_s30 = smov [#allocation16]  }
 0x125   : > { %2499 = vmatpush3.bf16.msra.mxu0 %v2848_v13  ;;  %2512 = vmatprep.mubr.bf16.mxu0 %v735_v20  ;;  %v2854_v32 = vld [vmem:[#allocation8 + $0x38] sm:$0xff]   ;;  %v3729_v33 = vld [vmem:[%s3678_s3 + $0x10] sm:$0xff]  ;;  %v3738_v36 = vld [vmem:[%s3678_s3 + $0x28] sm:$0xff]  ;;  %s4196_s14 = smov (!%p709_p2, %s2325_s14), 7  ;;  %p3156_p9 = scmp.ne.s32.totalorder %s4025_s16, %s3155_s29 }
 0x126   : > { %2525 = vmatpush3.bf16.msra.mxu1 %v2841_v2  ;;  %2500 = vmatprep.subr.bf16.mxu0 %v2849_v14  ;;  %v876_v31 = vpack.c.bf16 %v734_v28, %v733_v27  ;;  %v3732_v34 = vld [vmem:[%s3678_s3 + $0x18] sm:$0xff]  ;;  %v2855_v37 = vld [vmem:[#allocation11] sm:$0xff]   ;;  %v737_v39 = vpack.c.bf16 %v3738_v36, %v3735_v35  ;;  %v2856_v40 = vld [vmem:[#allocation11 + $0x8] sm:$0xff]  }
 0x127   : > { %2526 = vmatprep.subr.bf16.mxu1 %v2842_v3  ;;  %v736_v38 = vpack.c.bf16 %v3732_v34, %v3729_v33  ;;  %v3745_v41 = vld [vmem:[%s3678_s3 + $0x30] sm:$0xff]  ;;  %v3748_v42 = vld [vmem:[%s3678_s3 + $0x38] sm:$0xff]  ;;  %v2859_v47 = vld [vmem:[#allocation11 + $0x20] sm:$0xff]   ;;  %p4185_p3 = scmp.ne.s32.totalorder %s4183_s25, 0 }
 0x128   : > { %v2857_v43 = vld [vmem:[#allocation11 + $0x10] sm:$0xff]   ;;  %v738_v44 = vpack.c.bf16 %v3748_v42, %v3745_v41  ;;  %v2858_v46 = vld [vmem:[#allocation11 + $0x18] sm:$0xff]   ;;  %v2860_v48 = vld [vmem:[#allocation11 + $0x28] sm:$0xff]  }
 0x129   : > { %2501 = vmatpush3.bf16.msra.mxu0 %v2849_v14  ;;  %v2861_v49 = vld [vmem:[#allocation11 + $0x30] sm:$0xff]   ;;  %v2862_v50 = vld [vmem:[#allocation11 + $0x38] sm:$0xff]   ;;  %v2335_v53 = vld [vmem:[%s4175_s23] ss:$0 sm:$0xff]  ;;  %s3872_s23 = scalar_lea.vmem %s4179_s17, %s4196_s14  ;;  %p3157_p10 = pnand %p3156_p9, %p4185_p3 }
 0x12a   : > { %2527 = vmatpush3.bf16.msra.mxu1 %v2842_v3  ;;  %2502 = vmatprep.subr.bf16.mxu0 %v2850_v16  ;;  %v3768_v61 = vld [vmem:[%s4176_s8] sm:$0xff]   ;;  %s3159_s17 = sshll.u32 %s3253_s30, 4  ;;  %s3160_s17 = int_to_ptr.vmem [resolvable:$false] %s3159_s17 }
 0x12b   : > { %2528 = vmatprep.subr.bf16.mxu1 %v2843_v11  ;;  %v2326_v2 = vld [vmem:[%s4177_s1] ss:$0 sm:$0xff]  ;;  %s4181_s1 = sld [smem:[#allocation39_spill]]  ;;  %p3158_p1 = pneg %p3157_p10 }
 0x12c   : > { %p3162_p5 = scmp.lt.s32.totalorder %s4025_s16, %s3160_s17 }
 0x12d   : > { %2503 = vmatpush3.bf16.msra.mxu0 %v2850_v16 }
 0x12e   : > { %2529 = vmatpush3.bf16.msra.mxu1 %v2843_v11  ;;  %2504 = vmatprep.subr.bf16.mxu0 %v2851_v24  ;;  %v3781_v11 = vld [vmem:[%s4176_s8 + $0x8] sm:$0xff]  }
 0x12f   : > { %2530 = vmatprep.subr.bf16.mxu1 %v2844_v15 }
 0x131   : > { %2505 = vmatpush3.bf16.msra.mxu0 %v2851_v24  ;;  %v3794_v24 = vld [vmem:[%s4176_s8 + $0x10] sm:$0xff]  }
 0x132   : > { %2531 = vmatpush3.bf16.msra.mxu1 %v2844_v15  ;;  %2506 = vmatprep.subr.bf16.mxu0 %v2852_v29 }
 0x133   : > { %2532 = vmatprep.subr.bf16.mxu1 %v2845_v19 }
 0x135   : > { %2507 = vmatpush3.bf16.msra.mxu0 %v2852_v29 }
 0x136   : > { %2533 = vmatpush3.bf16.msra.mxu1 %v2845_v19  ;;  %2508 = vmatprep.subr.bf16.mxu0 %v2853_v30 }
 0x137   : > { %2534 = vmatprep.subr.bf16.mxu1 %v2846_v26 }
 0x139   : > { %2509 = vmatpush3.bf16.msra.mxu0 %v2853_v30 }
 0x13a   : > { %2535 = vmatpush3.bf16.msra.mxu1 %v2846_v26  ;;  %2510 = vmatprep.subr.bf16.mxu0 %v2854_v32 }
 0x13b   : > { %2560 = vmatprep.subr.bf16.mxu1 %v3251_v52 }
 0x13d   : > { %2537 = vmatmul.mubr.bf16.vlgmr.msra.gmra.mrb[0].mxu1 %v876_v31  ;;  %2511 = vmatpush3.bf16.msra.mxu0 %v2854_v32 }
 0x13e   : > { %2540 = vmatprep.subr.bf16.mxu0 %v2855_v37  ;;  %2568 = vmatprep.mubr.msk.bf16.mxu1 %vm3252_vm0, %v3251_v52 }
 0x140   : > { %2513 = vmatmul.mubr.bf16.vlgmr.msra.gmra.mrb[0].mxu0 %v736_v38  ;;  %v3811_v38 = vld [vmem:[%s4176_s8 + $0x18] sm:$0xff]  }
 0x141   : > { %2516 = vmatprep.mubr.bf16.mxu0 %v737_v39  ;;  %2541 = vmatpush3.bf16.msra.mxu0 %v2855_v37 }
 0x142   : > { %2542 = vmatprep.subr.bf16.mxu0 %v2856_v40 }
 0x145   : > { %2543 = vmatpush3.bf16.msra.mxu0 %v2856_v40 }
 0x146   : > { %2544 = vmatprep.subr.bf16.mxu0 %v2857_v43 }
 0x148   : > { %2517 = vmatmul.mubr.bf16.gmra.mrb[4].mxu0 %v738_v44 }
 0x149   : > { %2545 = vmatpush3.bf16.msra.mxu0 %v2857_v43  ;;  %2556 = vmatprep.mubr.bf16.mxu0 %v997_v45 }
 0x14a   : > { %2546 = vmatprep.subr.bf16.mxu0 %v2858_v46 }
 0x14d   : > { %2547 = vmatpush3.bf16.msra.mxu0 %v2858_v46 }
 0x14e   : > { %2548 = vmatprep.subr.bf16.mxu0 %v2859_v47 }
 0x151   : > { %2549 = vmatpush3.bf16.msra.mxu0 %v2859_v47 }
 0x152   : > { %2550 = vmatprep.subr.bf16.mxu0 %v2860_v48 }
 0x155   : > { %2551 = vmatpush3.bf16.msra.mxu0 %v2860_v48 }
 0x156   : > { %2552 = vmatprep.subr.bf16.mxu0 %v2861_v49 }
 0x159   : > { %2553 = vmatpush3.bf16.msra.mxu0 %v2861_v49 }
 0x15a   : > { %2554 = vmatprep.subr.bf16.mxu0 %v2862_v50 }
 0x15d   : > { %2555 = vmatpush3.bf16.msra.mxu0 %v2862_v50  ;;  %v2344_v50 = vld [vmem:[%s4178_s5] ss:$0 sm:$0xff]  ;;  %s4184_s5 = sld [smem:[#allocation42_spill]] }
 0x15e   : > { %2572 = vmatprep.subr.bf16.mxu0 %v3251_v52 }
 0x160   : > { %2557 = vmatmul.mubr.bf16.vlgmr.msra.gmra.mrb[8].mxu0 %v998_v51 }
 0x161   : > { %2580 = vmatprep.mubr.msk.bf16.mxu0 %vm3252_vm0, %v3251_v52 }
 0x163   : > { %s4023_s14 = scalar_lea.hbm %s4184_s5, %s2395_s13 }
 0x210   : > { %v2538_v54 = vpop.f32.mrb[0].mxu1 }
 0x211   : > { %v982_v55 = vpop.f32.mrb[1].mxu1  ;;  %v991_v31 = vadd.f32 %v2538_v54, %v2335_v53 }
 0x212   : > { %v983_v56 = vadd.f32 %v2335_v53, %v982_v55  ;;  %v2539_v57 = vpop.f32.mrb[2].mxu1 }
 0x213   : > { %v985_v58 = vpop.f32.mrb[3].mxu1  ;;  %v2514_v5 = vpop.f32.mrb[0].mxu0  ;;  %v994_v37 = vadd.f32 %v2539_v57, %v2335_v53  ;;  %v1129_v39 = vpack.c.bf16 %v991_v31, %v991_v31 }
 0x214   : > { %v1127_v59 = vpack.c.bf16 %v983_v56, %v983_v56  ;;  %v986_v60 = vadd.f32 %v2335_v53, %v985_v58  ;;  %v853_v7 = vadd.f32 %v2514_v5, %v2326_v2  ;;  %v844_v8 = vpop.f32.mrb[1].mxu0 }
 0x215   : > { %v845_v9 = vadd.f32 %v2326_v2, %v844_v8  ;;  %v2515_v10 = vpop.f32.mrb[2].mxu0  ;;  %v1130_v40 = vpack.c.bf16 %v994_v37, %v994_v37  ;;  %v1137_v44 = vrot.slane %v1129_v39, 4 }
 0x216   : > { %v1135_v62 = vrot.slane %v1127_v59, 4  ;;  %v1128_v63 = vpack.c.bf16 %v986_v60, %v986_v60  ;;  %v856_v12 = vadd.f32 %v2515_v10, %v2326_v2  ;;  %v847_v13 = vpop.f32.mrb[3].mxu0 }
 0x217   : > { %v848_v14 = vadd.f32 %v2326_v2, %v847_v13  ;;  %v1138_v46 = vrot.slane %v1130_v40, 4  ;;  %v1150_v47 = vsel %vm1139_vm1, %v1129_v39, %v1137_v44 }
 0x218   : > { %v1142_v0 = vsel %vm1139_vm1, %v1127_v59, %v1135_v62  ;;  %v1136_v1 = vrot.slane %v1128_v63, 4  ;;  %v1241_v15 = vpack.c.bf16 %v856_v12, %v853_v7  ;;  %v1188_v49 = vmul.bf16 %v3768_v61, %v1150_v47 }
 0x219   : > { %v1180_v3 = vmul.bf16 %v3768_v61, %v1142_v0  ;;  %v1240_v16 = vpack.c.bf16 %v848_v14, %v845_v9  ;;  %v1181_v17 = vmul.bf16 %v3781_v11, %v1142_v0  ;;  %v1182_v30 = vmul.bf16 %v3794_v24, %v1142_v0 }
 0x21a   : > { %v1146_v4 = vsel %vm1139_vm1, %v1128_v63, %v1136_v1  ;;  %v1183_v43 = vmul.bf16 %v3811_v38, %v1142_v0  ;;  %v1154_v48 = vsel %vm1139_vm1, %v1130_v40, %v1138_v46  ;;  %v1190_v13 = vmul.bf16 %v3794_v24, %v1150_v47 }
 0x21b   : > { %2561 = vmatpush3.bf16.xpose.msra.mxu1 %v1180_v3  ;;  %v1184_v6 = vmul.bf16 %v3768_v61, %v1146_v4  ;;  %v2518_v18 = vpop.f32.mrb[4].mxu0  ;;  %v1185_v19 = vmul.bf16 %v3781_v11, %v1146_v4  ;;  %v1186_v32 = vmul.bf16 %v3794_v24, %v1146_v4  ;;  %v1187_v45 = vmul.bf16 %v3811_v38, %v1146_v4 }
 0x21c   : > { %2562 = vmatprep.subr.bf16.mxu1 %v3251_v52  ;;  %v3786_v20 = vadd.f32 %v2518_v18, %v2326_v2  ;;  %v860_v21 = vpop.f32.mrb[5].mxu0  ;;  %v1192_v53 = vmul.bf16 %v3768_v61, %v1154_v48  ;;  %v1189_v4 = vmul.bf16 %v3781_v11, %v1150_v47  ;;  %v1193_v9 = vmul.bf16 %v3781_v11, %v1154_v48 }
 0x21d   : > { %2573 = vmatpush3.bf16.xpose.msra.mxu0 %v1184_v6  ;;  %v3789_v22 = vadd.f32 %v2326_v2, %v860_v21  ;;  %v2519_v23 = vpop.f32.mrb[6].mxu0  ;;  %v1194_v14 = vmul.bf16 %v3794_v24, %v1154_v48 }
 0x21e   : > { %2574 = vmatprep.subr.bf16.mxu0 %v3251_v52  ;;  %v3796_v25 = vadd.f32 %v2519_v23, %v2326_v2  ;;  %v863_v26 = vpop.f32.mrb[7].mxu0 }
 0x21f   : > { %v3799_v27 = vadd.f32 %v2326_v2, %v863_v26 }
 0x220   : > { %v1243_v28 = vpack.c.bf16 %v3796_v25, %v3786_v20 }
 0x221   : > { %v1242_v29 = vpack.c.bf16 %v3799_v27, %v3789_v22  ;;  %v2357_v22 = vld [vmem:[%s3872_s23] ss:$0 sm:$0xff] }
 0x223   : > { %2563 = vmatpush3.bf16.xpose.msra.mxu1 %v1181_v17 }
 0x224   : > { %2564 = vmatprep.subr.bf16.mxu1 %v3251_v52 }
 0x225   : > { %2575 = vmatpush3.bf16.xpose.msra.mxu0 %v1185_v19 }
 0x226   : > { %2576 = vmatprep.subr.bf16.mxu0 %v3251_v52 }
 0x22b   : > { %2565 = vmatpush3.bf16.xpose.msra.mxu1 %v1182_v30 }
 0x22c   : > { %2566 = vmatprep.subr.bf16.mxu1 %v3251_v52 }
 0x22d   : > { %2577 = vmatpush3.bf16.xpose.msra.mxu0 %v1186_v32 }
 0x22e   : > { %2578 = vmatprep.subr.bf16.mxu0 %v3251_v52 }
 0x233   : > { %2567 = vmatpush3.bf16.xpose.msra.mxu1 %v1183_v43  ;;  %v2558_v51 = vpop.f32.mrb[8].mxu0 }
 0x234   : > { %2584 = vmatprep.subr.bf16.mxu1 %v3251_v52  ;;  %v1113_v54 = vadd.f32 %v2558_v51, %v2344_v50  ;;  %v1104_v55 = vpop.f32.mrb[9].mxu0  ;;  %v1501_v51 = vld [vmem:[#allocation14] sm:$0xff] }
 0x235   : > { %2579 = vmatpush3.bf16.xpose.msra.mxu0 %v1187_v45  ;;  %v1105_v56 = vadd.f32 %v2344_v50, %v1104_v55  ;;  %v2559_v57 = vpop.f32.mrb[10].mxu0  ;;  %v1503_v55 = vld [vmem:[#allocation14 + $0x10] sm:$0xff] }
 0x236   : > { %2596 = vmatprep.subr.bf16.mxu0 %v3251_v52  ;;  %v1198_v58 = vpack.c.bf16 %v1113_v54, %v1113_v54  ;;  %v1116_v59 = vadd.f32 %v2559_v57, %v2344_v50  ;;  %v1107_v60 = vpop.f32.mrb[11].mxu0 }
 0x237   : > { %v1196_v62 = vpack.c.bf16 %v1105_v56, %v1105_v56  ;;  %v1108_v63 = vadd.f32 %v2344_v50, %v1107_v60  ;;  %v1504_v56 = vld [vmem:[#allocation14 + $0x18] sm:$0xff]  ;;  %v1507_v60 = vld [vmem:[#allocation14 + $0x30] sm:$0xff] }
 0x238   : > { %v1206_v0 = vrot.slane %v1198_v58, 4  ;;  %v1199_v1 = vpack.c.bf16 %v1116_v59, %v1116_v59  ;;  %v2712_v57 = vpack.c.bf16 %v1504_v56, %v1503_v55  ;;  %v1506_v59 = vld [vmem:[#allocation14 + $0x28] sm:$0xff] }
 0x239   : > { %v1204_v2 = vrot.slane %v1196_v62, 4  ;;  %v1197_v3 = vpack.c.bf16 %v1108_v63, %v1108_v63  ;;  %v1508_v63 = vld [vmem:[#allocation14 + $0x38] sm:$0xff] }
 0x23a   : > { %2569 = vmatmul.mubr.bf16.vlgmr.msra.gmra.mrb[4].mxu1 %v1240_v16  ;;  %v3833_v5 = vsel %vm1139_vm1, %v1198_v58, %v1206_v0  ;;  %v1207_v6 = vrot.slane %v1199_v1, 4  ;;  %v1195_v16 = vmul.bf16 %v3811_v38, %v1154_v48  ;;  %v1505_v58 = vld [vmem:[#allocation14 + $0x20] sm:$0xff] }
 0x23b   : > { %2585 = vmatpush3.bf16.xpose.msra.mxu1 %v1188_v49  ;;  %2592 = vmatprep.mubr.msk.bf16.mxu1 %vm3252_vm0, %v3251_v52  ;;  %v1210_v7 = vsel %vm1139_vm1, %v1196_v62, %v1204_v2  ;;  %v1205_v8 = vrot.slane %v1197_v3, 4  ;;  %v2716_v62 = vpack.c.bf16 %v1506_v59, %v1505_v58 }
 0x23c   : > { %2581 = vmatmul.mubr.bf16.vlgmr.msra.gmra.mrb[12].mxu0 %v1241_v15  ;;  %2586 = vmatprep.subr.bf16.mxu1 %v3251_v52  ;;  %v3838_v10 = vsel %vm1139_vm1, %v1199_v1, %v1207_v6  ;;  %v1191_v15 = vmul.bf16 %v3811_v38, %v1150_v47  ;;  %v1224_v17 = vmul.bf16 %v3768_v61, %v1210_v7  ;;  %v2359_v1 = vld [vmem:[%s3872_s23 + $0x2] ss:$0 sm:$0xff] }
 0x23d   : > { %2597 = vmatpush3.bf16.xpose.msra.mxu0 %v1192_v53  ;;  %2604 = vmatprep.mubr.msk.bf16.mxu0 %vm3252_vm0, %v3251_v52  ;;  %v3842_v12 = vsel %vm1139_vm1, %v1197_v3, %v1205_v8  ;;  %v1225_v18 = vmul.bf16 %v3781_v11, %v1210_v7  ;;  %v1226_v19 = vmul.bf16 %v3794_v24, %v1210_v7  ;;  %v1502_v53 = vld [vmem:[#allocation14 + $0x8] sm:$0xff]  ;;  %v2360_v8 = vld [vmem:[%s3872_s23 + $0x3] ss:$0 sm:$0xff] }
 0x23e   : > { %2598 = vmatprep.subr.bf16.mxu0 %v3251_v52  ;;  %v1227_v21 = vmul.bf16 %v3811_v38, %v1210_v7  ;;  %v2708_v54 = vpack.c.bf16 %v1502_v53, %v1501_v51  ;;  %v1231_v55 = vmul.bf16 %v3811_v38, %v3842_v12 }
 0x243   : > { %2587 = vmatpush3.bf16.xpose.msra.mxu1 %v1189_v4  ;;  %v2720_v4 = vpack.c.bf16 %v1508_v63, %v1507_v60 }
 0x244   : > { %2588 = vmatprep.subr.bf16.mxu1 %v3251_v52 }
 0x245   : > { %2599 = vmatpush3.bf16.xpose.msra.mxu0 %v1193_v9 }
 0x246   : > { %2600 = vmatprep.subr.bf16.mxu0 %v3251_v52 }
 0x24b   : > { %2589 = vmatpush3.bf16.xpose.msra.mxu1 %v1190_v13 }
 0x24c   : > { %2590 = vmatprep.subr.bf16.mxu1 %v3251_v52 }
 0x24d   : > { %2601 = vmatpush3.bf16.xpose.msra.mxu0 %v1194_v14 }
 0x24e   : > { %2602 = vmatprep.subr.bf16.mxu0 %v3251_v52 }
 0x253   : > { %2591 = vmatpush3.bf16.xpose.msra.mxu1 %v1191_v15 }
 0x254   : > { %2636 = vmatprep.subr.bf16.mxu1 %v3251_v52 }
 0x255   : > { %2603 = vmatpush3.bf16.xpose.msra.mxu0 %v1195_v16 }
 0x256   : > { %2709 = vmatprep.subr.bf16.mxu0 %v2708_v54 }
 0x25a   : > { %2593 = vmatmul.mubr.bf16.vlgmr.msra.gmra.mrb[8].mxu1 %v1242_v29 }
 0x25b   : > { %2637 = vmatpush3.bf16.msra.mxu1 %v1224_v17  ;;  %2644 = vmatprep.mubr.msk.bf16.mxu1 %vm3252_vm0, %v3251_v52 }
 0x25c   : > { %2605 = vmatmul.mubr.bf16.vlgmr.msra.gmra.mrb[16].mxu0 %v1243_v28  ;;  %2638 = vmatprep.subr.bf16.mxu1 %v3251_v52  ;;  %v2358_v28 = vld [vmem:[%s3872_s23 + $0x1] ss:$0 sm:$0xff]  ;;  %s3161_s23 = scalar_lea.vmem %s3160_s17, 2048 }
 0x25d   : > { %2711 = vmatpush3.bf16.msra.mxu0 %v2708_v54  ;;  %v1230_v54 = vmul.bf16 %v3794_v24, %v3842_v12  ;;  %p3163_p4 = scmp.lt.s32.totalorder %s3161_s23, %s3155_s29 }
 0x25e   : > { %2713 = vmatprep.subr.bf16.mxu0 %v2712_v57 }
 0x25f   : > { %2639 = vmatpush3.bf16.msra.mxu1 %v1225_v18  ;;  %p3164_p0 = por %p3163_p4, %p3162_p5 }
 0x260   : > { %2640 = vmatprep.subr.bf16.mxu1 %v3251_v52 }
 0x261   : > { %2715 = vmatpush3.bf16.msra.mxu0 %v2712_v57  ;;  %p3165_p12 = pnand %p3164_p0, %p3158_p1 }
 0x262   : > { %2717 = vmatprep.subr.bf16.mxu0 %v2716_v62 }
 0x263   : > { %2641 = vmatpush3.bf16.msra.mxu1 %v1226_v19 }
 0x264   : > { %2642 = vmatprep.subr.bf16.mxu1 %v3251_v52 }
 0x265   : > { %2719 = vmatpush3.bf16.msra.mxu0 %v2716_v62 }
 0x266   : > { %2721 = vmatprep.subr.bf16.mxu0 %v2720_v4 }
 0x267   : > { %2643 = vmatpush3.bf16.msra.mxu1 %v1227_v21 }
 0x268   : > { %2660 = vmatprep.subr.bf16.mxu1 %v3251_v52 }
 0x269   : > { %2723 = vmatpush3.bf16.msra.mxu0 %v2720_v4 }
 0x26a   : > { %2648 = vmatprep.subr.bf16.mxu0 %v3251_v52 }
 0x30d   : > { %v1278_v20 = vpop.f32.mrb[4].mxu1 }
 0x30e   : > { %v1408_v23 = vmul.f32 0.25, %v1278_v20  ;;  %v2570_v25 = vpop.f32.mrb[5].mxu1 }
 0x30f   : > { %v1281_v26 = vpop.f32.mrb[6].mxu1  ;;  %v1319_v27 = vpop.f32.mrb[12].mxu0 }
 0x310   : > { %v1409_v29 = vmul.f32 0.25, %v1281_v26  ;;  %v1410_v30 = vmul.f32 0.25, %v1319_v27  ;;  %v2571_v31 = vpop.f32.mrb[7].mxu1  ;;  %v2582_v32 = vpop.f32.mrb[13].mxu0  ;;  %v3876_v37 = vadd.f32 %v2357_v22, %v1408_v23 }
 0x311   : > { %v1322_v39 = vpop.f32.mrb[14].mxu0 }
 0x312   : > { %v1411_v40 = vmul.f32 0.25, %v1322_v39  ;;  %v2583_v43 = vpop.f32.mrb[15].mxu0  ;;  %v1453_v44 = vsel %vm1452_vm2, %v3876_v37, -inf  ;;  %v3880_v45 = vadd.f32 %v2358_v28, %v1410_v30  ;;  %v3882_v46 = vadd.f32 %v2357_v22, %v1409_v29 }
 0x313   : > { %1454 = vmax.xlane.f32.xlu0 %v1453_v44 }
 0x314   : > { %v1459_v47 = vsel %vm1452_vm2, %v3880_v45, -inf  ;;  %v3886_v48 = vadd.f32 %v2358_v28, %v1411_v40  ;;  %v1456_v49 = vsel %vm1452_vm2, %v3882_v46, -inf }
 0x315   : > { %1460 = vmax.xlane.f32.xlu1 %v1459_v47 }
 0x316   : > { %v1462_v50 = vsel %vm1452_vm2, %v3886_v48, -inf }
 0x317   : > { %1457 = vmax.xlane.f32.xlu0 %v1456_v49 }
 0x319   : > { %1463 = vmax.xlane.f32.xlu1 %v1462_v50 }
 0x32d   : > { %v1360_v0 = vpop.f32.mrb[8].mxu1 }
 0x32e   : > { %v1412_v2 = vmul.f32 0.25, %v1360_v0  ;;  %v2594_v3 = vpop.f32.mrb[9].mxu1 }
 0x32f   : > { %v1363_v6 = vpop.f32.mrb[10].mxu1  ;;  %v1401_v7 = vpop.f32.mrb[16].mxu0 }
 0x330   : > { %v1413_v9 = vmul.f32 0.25, %v1363_v6  ;;  %v1414_v13 = vmul.f32 0.25, %v1401_v7  ;;  %v2595_v14 = vpop.f32.mrb[11].mxu1  ;;  %v2606_v15 = vpop.f32.mrb[17].mxu0  ;;  %v1448_v16 = vadd.f32 %v2359_v1, %v1412_v2 }
 0x331   : > { %v1404_v17 = vpop.f32.mrb[18].mxu0 }
 0x332   : > { %v1415_v18 = vmul.f32 0.25, %v1404_v17  ;;  %v2607_v19 = vpop.f32.mrb[19].mxu0  ;;  %v1465_v21 = vsel %vm1452_vm2, %v1448_v16, -inf  ;;  %v1449_v20 = vadd.f32 %v2359_v1, %v1413_v9  ;;  %v1450_v22 = vadd.f32 %v2360_v8, %v1414_v13 }
 0x333   : > { %1466 = vmax.xlane.f32.xlu0 %v1465_v21 }
 0x334   : > { %v1468_v23 = vsel %vm1452_vm2, %v1449_v20, -inf  ;;  %v1451_v25 = vadd.f32 %v2360_v8, %v1415_v18  ;;  %v1471_v26 = vsel %vm1452_vm2, %v1450_v22, -inf }
 0x335   : > { %1469 = vmax.xlane.f32.xlu1 %v1468_v23 }
 0x336   : > { %v1474_v27 = vsel %vm1452_vm2, %v1451_v25, -inf }
 0x337   : > { %1472 = vmax.xlane.f32.xlu0 %v1471_v26 }
 0x339   : > { %1475 = vmax.xlane.f32.xlu1 %v1474_v27 }
 0x3a0   : > { %v1455_v28 = vpop.xlane.xlu0 %1454 }
 0x3a1   : > { %v1477_v29 = vsub.f32 %v3876_v37, %v1455_v28  ;;  %v1233_v28 = vmul.bf16 %v3781_v11, %v3833_v5 }
 0x3a2   : > { %v1461_v30 = vpop.xlane.xlu1 %1460 }
 0x3a3   : > { %v1485_v31 = vmul.f32 1.442695, %v1477_v29  ;;  %v1479_v32 = vsub.f32 %v3880_v45, %v1461_v30  ;;  %v1228_v45 = vmul.bf16 %v3768_v61, %v3842_v12  ;;  %v1236_v29 = vmul.bf16 %v3768_v61, %v3838_v10 }
 0x3a4   : > { %v1458_v39 = vpop.xlane.xlu0 %1457  ;;  %v1234_v30 = vmul.bf16 %v3794_v24, %v3833_v5 }
 0x3a5   : > { %2875 = vpow2.f32 %v1485_v31  ;;  %v1478_v40 = vsub.f32 %v3882_v46, %v1458_v39  ;;  %v1489_v43 = vmul.f32 1.442695, %v1479_v32  ;;  %v1237_v31 = vmul.bf16 %v3781_v11, %v3838_v10 }
 0x3a6   : > { %v1464_v44 = vpop.xlane.xlu1 %1463  ;;  %v1235_v32 = vmul.bf16 %v3811_v38, %v3833_v5  ;;  %v1238_v39 = vmul.bf16 %v3794_v24, %v3838_v10 }
 0x3a7   : > { %v1487_v47 = vmul.f32 1.442695, %v1478_v40  ;;  %v1480_v49 = vsub.f32 %v3886_v48, %v1464_v44  ;;  %v1229_v48 = vmul.bf16 %v3781_v11, %v3842_v12 }
 0x3a9   : > { %2877 = vpow2.f32 %v1487_v47  ;;  %v1491_v50 = vmul.f32 1.442695, %v1480_v49 }
 0x3aa   : > { %2879 = vpow2.f32 %v1489_v43  ;;  %v1239_v43 = vmul.bf16 %v3811_v38, %v3838_v10  ;;  %v2869_v10 = vld [vmem:[#allocation13 + $0x10] sm:$0xff]  }
 0x3ab   : > { %2881 = vpow2.f32 %v1491_v50 }
 0x3af   : > { %v2876_v51 = vpop.eup %2875 }
 0x3b0   : > { %2624 = vmatprep.mubr.msk.f32.mxu0 %vm1452_vm2, %v2876_v51 }
 0x3b3   : > { %v2878_v37 = vpop.eup %2877 }
 0x3b4   : > { %v2880_v53 = vpop.eup %2879  ;;  %2625 = vmatmul.mubr.msk.f32.vlgmr.msra.gmra.mrb[20].mxu0 %vm1452_vm2, %v2878_v37 }
 0x3b5   : > { %2649 = vmatpush3.bf16.msra.mxu0 %v1228_v45  ;;  %2627 = vmatprep.mubr.msk.f32.mxu0 %vm1452_vm2, %v2880_v53  ;;  %v2882_v46 = vpop.eup %2881  ;;  %v2868_v45 = vld [vmem:[#allocation13 + $0x8] sm:$0xff]  }
 0x3b6   : > { %2650 = vmatprep.subr.bf16.mxu0 %v3251_v52 }
 0x3b8   : > { %2628 = vmatmul.mubr.msk.f32.gmra.mrb[22].mxu0 %vm1452_vm2, %v2882_v46 }
 0x3b9   : > { %2651 = vmatpush3.bf16.msra.mxu0 %v1229_v48  ;;  %v2870_v48 = vld [vmem:[#allocation13 + $0x18] sm:$0xff]  }
 0x3ba   : > { %2652 = vmatprep.subr.bf16.mxu0 %v3251_v52 }
 0x3bd   : > { %2653 = vmatpush3.bf16.msra.mxu0 %v1230_v54  ;;  %v2871_v54 = vld [vmem:[#allocation13 + $0x20] sm:$0xff]  }
 0x3be   : > { %2654 = vmatprep.subr.bf16.mxu0 %v3251_v52 }
 0x3c0   : > { %v1467_v56 = vpop.xlane.xlu0 %1466 }
 0x3c1   : > { %2655 = vmatpush3.bf16.msra.mxu0 %v1231_v55  ;;  %v1481_v57 = vsub.f32 %v1448_v16, %v1467_v56  ;;  %v2872_v55 = vld [vmem:[#allocation13 + $0x28] sm:$0xff]   ;;  %v2873_v56 = vld [vmem:[#allocation13 + $0x30] sm:$0xff]  }
 0x3c2   : > { %v1470_v58 = vpop.xlane.xlu1 %1469  ;;  %2672 = vmatprep.subr.bf16.mxu0 %v3251_v52 }
 0x3c3   : > { %v1493_v59 = vmul.f32 1.442695, %v1481_v57  ;;  %v1482_v60 = vsub.f32 %v1449_v20, %v1470_v58  ;;  %v2874_v57 = vld [vmem:[#allocation13 + $0x38] sm:$0xff]  }
 0x3c4   : > { %v1473_v62 = vpop.xlane.xlu0 %1472 }
 0x3c5   : > { %2883 = vpow2.f32 %v1493_v59  ;;  %v1495_v63 = vmul.f32 1.442695, %v1482_v60  ;;  %v1483_v0 = vsub.f32 %v1450_v22, %v1473_v62 }
 0x3c6   : > { %v1476_v1 = vpop.xlane.xlu1 %1475 }
 0x3c7   : > { %2885 = vpow2.f32 %v1495_v63  ;;  %v1497_v2 = vmul.f32 1.442695, %v1483_v0  ;;  %v1484_v3 = vsub.f32 %v1451_v25, %v1476_v1  ;;  %v1232_v25 = vmul.bf16 %v3768_v61, %v3833_v5  ;;  %v2867_v61 = vld [vmem:[#allocation13] sm:$0xff]  }
 0x3c9   : > { %2887 = vpow2.f32 %v1497_v2  ;;  %v1499_v4 = vmul.f32 1.442695, %v1484_v3 }
 0x3cb   : > { %2889 = vpow2.f32 %v1499_v4 }
 0x3cf   : > { %v3919_v12 = vpop.eup %2883 }
 0x3d0   : > { %2630 = vmatprep.mubr.msk.f32.mxu0 %vm1452_vm2, %v3919_v12 }
 0x3d1   : > { %v3923_v6 = vpop.eup %2885 }
 0x3d2   : > { %2631 = vmatmul.mubr.msk.f32.gmra.mrb[24].mxu0 %vm1452_vm2, %v3923_v6 }
 0x3d3   : > { %v3927_v7 = vpop.eup %2887 }
 0x3d4   : > { %2633 = vmatprep.mubr.msk.f32.mxu0 %vm1452_vm2, %v3927_v7 }
 0x3d5   : > { %v3931_v8 = vpop.eup %2889 }
 0x3d6   : > { %2634 = vmatmul.mubr.msk.f32.gmra.mrb[26].mxu0 %vm1452_vm2, %v3931_v8 }
 0x3d7   : > { %2656 = vmatprep.mubr.msk.bf16.mxu0 %vm3252_vm0, %v3251_v52 }
 0x487   : > { %v2626_v9 = vpop.f32.mrb[20].mxu0 }
 0x488   : > { %2891 = vrcp.f32 %v2626_v9  ;;  %v1599_v13 = vpop.f32.mrb[21].mxu0 }
 0x489   : > { %2893 = vrcp.f32 %v1599_v13 }
 0x48b   : > { %v2629_v14 = vpop.f32.mrb[22].mxu0 }
 0x48c   : > { %2895 = vrcp.f32 %v2629_v14  ;;  %v1609_v15 = vpop.f32.mrb[23].mxu0 }
 0x48d   : > { %2897 = vrcp.f32 %v1609_v15 }
 0x492   : > { %v2892_v16 = vpop.eup %2891 }
 0x493   : > { %v2894_v17 = vpop.eup %2893  ;;  %v1647_v18 = vmul.f32 %v2892_v16, %v2878_v37 }
 0x494   : > { %v1646_v19 = vmul.f32 %v2894_v17, %v2876_v51 }
 0x496   : > { %v2896_v21 = vpop.eup %2895  ;;  %v1654_v20 = vpack.c.bf16 %v1647_v18, %v1646_v19  ;;  %v2373_v18 = vld [vmem:[%s4180_s4] ss:$0 sm:$0xff] }
 0x497   : > { %v2898_v22 = vpop.eup %2897  ;;  %v1649_v23 = vmul.f32 %v2896_v21, %v2882_v46 }
 0x498   : > { %v1648_v26 = vmul.f32 %v2898_v22, %v2880_v53  ;;  %2645 = vmatmul.mubr.msk.bf16.vlgmr.msra.gmra.mrb[12].mxu1 %vm1452_vm2, %v1654_v20 }
 0x499   : > { %2661 = vmatpush3.bf16.msra.mxu1 %v1232_v25  ;;  %2668 = vmatprep.mubr.msk.bf16.mxu1 %vm3252_vm0, %v3251_v52 }
 0x49a   : > { %v1655_v27 = vpack.c.bf16 %v1649_v23, %v1648_v26  ;;  %2662 = vmatprep.subr.bf16.mxu1 %v3251_v52 }
 0x49c   : > { %2657 = vmatmul.mubr.msk.bf16.vlgmr.msra.gmra.mrb[28].mxu0 %vm1452_vm2, %v1655_v27 }
 0x49d   : > { %2663 = vmatpush3.bf16.msra.mxu1 %v1233_v28  ;;  %2673 = vmatpush3.bf16.msra.mxu0 %v1236_v29 }
 0x49e   : > { %2664 = vmatprep.subr.bf16.mxu1 %v3251_v52  ;;  %2674 = vmatprep.subr.bf16.mxu0 %v3251_v52 }
 0x49f   : > { %2680 = vmatprep.mubr.msk.bf16.mxu0 %vm3252_vm0, %v3251_v52 }
 0x4a1   : > { %2665 = vmatpush3.bf16.msra.mxu1 %v1234_v30  ;;  %2675 = vmatpush3.bf16.msra.mxu0 %v1237_v31  ;;  %v2923_v30 = vld [vmem:[%s3678_s3] sm:$0xff] }
 0x4a2   : > { %2666 = vmatprep.subr.bf16.mxu1 %v3251_v52  ;;  %2676 = vmatprep.subr.bf16.mxu0 %v3251_v52 }
 0x4a5   : > { %2667 = vmatpush3.bf16.msra.mxu1 %v1235_v32  ;;  %2677 = vmatpush3.bf16.msra.mxu0 %v1238_v39  ;;  %v2632_v40 = vpop.f32.mrb[24].mxu0 }
 0x4a6   : > { %2899 = vrcp.f32 %v2632_v40  ;;  %v1619_v11 = vpop.f32.mrb[25].mxu0  ;;  %2678 = vmatprep.subr.bf16.mxu0 %v3251_v52  ;;  %2684 = vmatprep.subr.bf16.mxu1 %v2867_v61 }
 0x4a7   : > { %2901 = vrcp.f32 %v1619_v11 }
 0x4a9   : > { %2679 = vmatpush3.bf16.msra.mxu0 %v1239_v43  ;;  %v2635_v44 = vpop.f32.mrb[26].mxu0 }
 0x4aa   : > { %2903 = vrcp.f32 %v2635_v44  ;;  %v1629_v47 = vpop.f32.mrb[27].mxu0 }
 0x4ab   : > { %2905 = vrcp.f32 %v1629_v47 }
 0x4b0   : > { %v2900_v5 = vpop.eup %2899 }
 0x4b1   : > { %v2902_v49 = vpop.eup %2901  ;;  %v1651_v24 = vmul.f32 %v2900_v5, %v3923_v6 }
 0x4b2   : > { %v1650_v50 = vmul.f32 %v2902_v49, %v3919_v12 }
 0x4b4   : > { %v2904_v51 = vpop.eup %2903  ;;  %v1656_v37 = vpack.c.bf16 %v1651_v24, %v1650_v50 }
 0x4b5   : > { %v2906_v52 = vpop.eup %2905  ;;  %v1653_v53 = vmul.f32 %v2904_v51, %v3931_v8 }
 0x4b6   : > { %v1652_v46 = vmul.f32 %v2906_v52, %v3927_v7  ;;  %2669 = vmatmul.mubr.msk.bf16.vlgmr.msra.gmra.mrb[16].mxu1 %vm1452_vm2, %v1656_v37 }
 0x4b7   : > { %2685 = vmatpush3.bf16.msra.mxu1 %v2867_v61  ;;  %v2924_v61 = vld [vmem:[%s3678_s3 + $0x8] sm:$0xff] }
 0x4b8   : > { %v1657_v38 = vpack.c.bf16 %v1653_v53, %v1652_v46  ;;  %2686 = vmatprep.subr.bf16.mxu1 %v2868_v45 }
 0x4ba   : > { %2681 = vmatmul.mubr.msk.bf16.vlgmr.msra.gmra.mrb[32].mxu0 %vm1452_vm2, %v1657_v38 }
 0x4bb   : > { %2687 = vmatpush3.bf16.msra.mxu1 %v2868_v45 }
 0x4bc   : > { %2688 = vmatprep.subr.bf16.mxu1 %v2869_v10 }
 0x4bf   : > { %2689 = vmatpush3.bf16.msra.mxu1 %v2869_v10 }
 0x4c0   : > { %2690 = vmatprep.subr.bf16.mxu1 %v2870_v48 }
 0x4c3   : > { %2691 = vmatpush3.bf16.msra.mxu1 %v2870_v48 }
 0x4c4   : > { %2692 = vmatprep.subr.bf16.mxu1 %v2871_v54 }
 0x4c7   : > { %2693 = vmatpush3.bf16.msra.mxu1 %v2871_v54 }
 0x4c8   : > { %2694 = vmatprep.subr.bf16.mxu1 %v2872_v55 }
 0x4cb   : > { %2695 = vmatpush3.bf16.msra.mxu1 %v2872_v55 }
 0x4cc   : > { %2696 = vmatprep.subr.bf16.mxu1 %v2873_v56 }
 0x4cf   : > { %2697 = vmatpush3.bf16.msra.mxu1 %v2873_v56 }
 0x4d0   : > { %2698 = vmatprep.subr.bf16.mxu1 %v2874_v57 }
 0x4d3   : > { %2699 = vmatpush3.bf16.msra.mxu1 %v2874_v57 }
 0x56b   : > { %v1695_v58 = vpop.f32.mrb[12].mxu1 }
 0x56c   : > { %v2646_v59 = vpop.f32.mrb[13].mxu1 }
 0x56d   : > { %v1698_v60 = vpop.f32.mrb[14].mxu1 }
 0x56e   : > { %v1834_v62 = vpack.c.bf16 %v1698_v60, %v1695_v58  ;;  %v2647_v63 = vpop.f32.mrb[15].mxu1 }
 0x56f   : > { %v1739_v0 = vpop.f32.mrb[28].mxu0 }
 0x570   : > { %v2658_v1 = vpop.f32.mrb[29].mxu0  ;;  %2700 = vmatprep.mubr.bf16.mxu1 %v1834_v62 }
 0x571   : > { %v1742_v2 = vpop.f32.mrb[30].mxu0 }
 0x572   : > { %v1835_v3 = vpack.c.bf16 %v1742_v2, %v1739_v0  ;;  %v2659_v4 = vpop.f32.mrb[31].mxu0 }
 0x574   : > { %2701 = vmatmul.mubr.bf16.vlgmr.msra.gmra.mrb[20].mxu1 %v1835_v3 }
 0x589   : > { %v1783_v12 = vpop.f32.mrb[16].mxu1 }
 0x58a   : > { %v2670_v6 = vpop.f32.mrb[17].mxu1 }
 0x58b   : > { %v1786_v7 = vpop.f32.mrb[18].mxu1 }
 0x58c   : > { %v1836_v8 = vpack.c.bf16 %v1786_v7, %v1783_v12  ;;  %v2671_v9 = vpop.f32.mrb[19].mxu1 }
 0x58d   : > { %v1827_v13 = vpop.f32.mrb[32].mxu0 }
 0x58e   : > { %v2682_v14 = vpop.f32.mrb[33].mxu0  ;;  %2704 = vmatprep.mubr.bf16.mxu1 %v1836_v8 }
 0x58f   : > { %v1830_v15 = vpop.f32.mrb[34].mxu0 }
 0x590   : > { %v1837_v16 = vpack.c.bf16 %v1830_v15, %v1827_v13  ;;  %v2683_v17 = vpop.f32.mrb[35].mxu0 }
 0x592   : > { %2705 = vmatmul.mubr.bf16.gmra.mrb[24].mxu1 %v1837_v16 }
 0x647   : > { %v2702_v19 = vpop.f32.mrb[20].mxu1 }
 0x648   : > { %v1952_v21 = vadd.f32 %v2702_v19, %v2373_v18  ;;  %v1943_v20 = vpop.f32.mrb[21].mxu1 }
 0x649   : > { %v2703_v22 = vpop.f32.mrb[22].mxu1  ;;  %v1944_v23 = vadd.f32 %v2373_v18, %v1943_v20 }
 0x64a   : > { %v1955_v25 = vadd.f32 %v2703_v22, %v2373_v18  ;;  %v1946_v26 = vpop.f32.mrb[23].mxu1  ;;  %v1976_v27 = vadd.f32 %v1952_v21, %v3729_v33 }
 0x64b   : > { %v1947_v28 = vadd.f32 %v2373_v18, %v1946_v26  ;;  %v1974_v31 = vadd.f32 %v2923_v30, %v1944_v23  ;;  %v2383_v30 = vld [vmem:[%s4182_s27] ss:$0 sm:$0xff] }
 0x64c   : > { %1986 = vadd.xlane.f32.xlu0 %v1976_v27  ;;  %v1977_v29 = vadd.f32 %v1955_v25, %v3732_v34 }
 0x64d   : > { %v1975_v32 = vadd.f32 %v2924_v61, %v1947_v28 }
 0x64e   : > { %1988 = vadd.xlane.f32.xlu1 %v1977_v29 }
 0x650   : > { %1982 = vadd.xlane.f32.xlu0 %v1974_v31 }
 0x652   : > { %1984 = vadd.xlane.f32.xlu1 %v1975_v32 }
 0x665   : > { %v2706_v39 = vpop.f32.mrb[24].mxu1 }
 0x666   : > { %v1959_v40 = vpop.f32.mrb[25].mxu1  ;;  %v1968_v47 = vadd.f32 %v2706_v39, %v2373_v18 }
 0x667   : > { %v1960_v11 = vadd.f32 %v2373_v18, %v1959_v40  ;;  %v2707_v43 = vpop.f32.mrb[26].mxu1 }
 0x668   : > { %v1962_v44 = vpop.f32.mrb[27].mxu1  ;;  %v1971_v49 = vadd.f32 %v2707_v43, %v2373_v18  ;;  %v1980_v24 = vadd.f32 %v1968_v47, %v3745_v41 }
 0x669   : > { %v1963_v5 = vadd.f32 %v2373_v18, %v1962_v44  ;;  %v1978_v33 = vadd.f32 %v1960_v11, %v3735_v35 }
 0x66a   : > { %v1981_v50 = vadd.f32 %v1971_v49, %v3748_v42 }
 0x66b   : > { %1990 = vadd.xlane.f32.xlu0 %v1978_v33  ;;  %v1979_v34 = vadd.f32 %v1963_v5, %v3738_v36 }
 0x66d   : > { %1992 = vadd.xlane.f32.xlu1 %v1979_v34 }
 0x66f   : > { %1994 = vadd.xlane.f32.xlu0 %v1980_v24 }
 0x671   : > { %1996 = vadd.xlane.f32.xlu1 %v1981_v50 }
 0x6d9   : > { %v1987_v51 = vpop.xlane.xlu0 %1986 }
 0x6da   : > { %v2001_v37 = vmul.f32 0.0078125, %v1987_v51 }
 0x6db   : > { %v1989_v45 = vpop.xlane.xlu1 %1988 }
 0x6dc   : > { %v2009_v52 = vsub.f32 %v1976_v27, %v2001_v37  ;;  %v2002_v53 = vmul.f32 0.0078125, %v1989_v45  ;;  %v2382_v27 = vld [vmem:[%s4181_s1] ss:$0 sm:$0xff] }
 0x6dd   : > { %v1983_v46 = vpop.xlane.xlu0 %1982 }
 0x6de   : > { %v2010_v38 = vsub.f32 %v1977_v29, %v2002_v53  ;;  %v1999_v10 = vmul.f32 0.0078125, %v1983_v46  ;;  %v2017_v35 = vmul.f32 %v2009_v52, %v2009_v52 }
 0x6df   : > { %v1985_v48 = vpop.xlane.xlu1 %1984 }
 0x6e0   : > { %v2007_v54 = vsub.f32 %v1974_v31, %v1999_v10  ;;  %v2000_v55 = vmul.f32 0.0078125, %v1985_v48  ;;  %2027 = vadd.xlane.f32.xlu0 %v2017_v35  ;;  %v2018_v36 = vmul.f32 %v2010_v38, %v2010_v38 }
 0x6e2   : > { %v2008_v56 = vsub.f32 %v1975_v32, %v2000_v55  ;;  %2029 = vadd.xlane.f32.xlu1 %v2018_v36  ;;  %v2015_v41 = vmul.f32 %v2007_v54, %v2007_v54 }
 0x6e4   : > { %2023 = vadd.xlane.f32.xlu0 %v2015_v41  ;;  %v2016_v42 = vmul.f32 %v2008_v56, %v2008_v56 }
 0x6e6   : > { %2025 = vadd.xlane.f32.xlu1 %v2016_v42 }
 0x6f8   : > { %v1991_v57 = vpop.xlane.xlu0 %1990 }
 0x6f9   : > { %v2003_v58 = vmul.f32 0.0078125, %v1991_v57 }
 0x6fa   : > { %v1993_v59 = vpop.xlane.xlu1 %1992 }
 0x6fb   : > { %v3982_v60 = vsub.f32 %v1978_v33, %v2003_v58  ;;  %v2004_v62 = vmul.f32 0.0078125, %v1993_v59 }
 0x6fc   : > { %v1995_v63 = vpop.xlane.xlu0 %1994 }
 0x6fd   : > { %v3984_v0 = vsub.f32 %v1979_v34, %v2004_v62  ;;  %v2005_v1 = vmul.f32 0.0078125, %v1995_v63  ;;  %v2019_v2 = vmul.f32 %v3982_v60, %v3982_v60 }
 0x6fe   : > { %v1997_v3 = vpop.xlane.xlu1 %1996 }
 0x6ff   : > { %v3988_v4 = vsub.f32 %v1980_v24, %v2005_v1  ;;  %v2006_v12 = vmul.f32 0.0078125, %v1997_v3  ;;  %2031 = vadd.xlane.f32.xlu0 %v2019_v2  ;;  %v2020_v6 = vmul.f32 %v3984_v0, %v3984_v0 }
 0x701   : > { %v3992_v7 = vsub.f32 %v1981_v50, %v2006_v12  ;;  %2033 = vadd.xlane.f32.xlu1 %v2020_v6  ;;  %v2021_v8 = vmul.f32 %v3988_v4, %v3988_v4 }
 0x703   : > { %2035 = vadd.xlane.f32.xlu0 %v2021_v8  ;;  %v2022_v9 = vmul.f32 %v3992_v7, %v3992_v7 }
 0x705   : > { %2037 = vadd.xlane.f32.xlu1 %v2022_v9 }
 0x76d   : > { %v2028_v13 = vpop.xlane.xlu0 %2027 }
 0x76e   : > { %v2041_v14 = vmul.f32 0.0078125, %v2028_v13 }
 0x76f   : > { %v2030_v15 = vpop.xlane.xlu1 %2029 }
 0x770   : > { %v2049_v16 = vadd.f32 1e-05, %v2041_v14  ;;  %v2042_v17 = vmul.f32 0.0078125, %v2030_v15 }
 0x771   : > { %v2024_v18 = vpop.xlane.xlu0 %2023 }
 0x772   : > { %2907 = vrsqrt.f32 %v2049_v16  ;;  %v2050_v19 = vadd.f32 1e-05, %v2042_v17  ;;  %v2039_v21 = vmul.f32 0.0078125, %v2024_v18 }
 0x773   : > { %v2026_v20 = vpop.xlane.xlu1 %2025 }
 0x774   : > { %2909 = vrsqrt.f32 %v2050_v19  ;;  %v2047_v22 = vadd.f32 1e-05, %v2039_v21  ;;  %v2040_v23 = vmul.f32 0.0078125, %v2026_v20 }
 0x776   : > { %2911 = vrsqrt.f32 %v2047_v22  ;;  %v2048_v25 = vadd.f32 1e-05, %v2040_v23 }
 0x778   : > { %2913 = vrsqrt.f32 %v2048_v25 }
 0x77c   : > { %v2908_v26 = vpop.eup %2907 }
 0x77d   : > { %v2065_v28 = vmul.f32 %v2908_v26, %v2009_v52 }
 0x77e   : > { %v2910_v29 = vpop.eup %2909 }
 0x77f   : > { %v2080_v31 = vmul.f32 %v2382_v27, %v2065_v28  ;;  %v2066_v61 = vmul.f32 %v2910_v29, %v2010_v38 }
 0x780   : > { %v2912_v32 = vpop.eup %2911 }
 0x781   : > { %v2095_v39 = vadd.f32 %v2383_v30, %v2080_v31  ;;  %v2081_v40 = vmul.f32 %v2382_v27, %v2066_v61  ;;  %v2063_v11 = vmul.f32 %v2912_v32, %v2007_v54 }
 0x782   : > { %v2914_v43 = vpop.eup %2913 }
 0x783   : > { %2103 = vst [vmem:[%s4006_s11 + $0x10] sm:$0xff] %v2095_v39  ;;  %v2096_v44 = vadd.f32 %v2383_v30, %v2081_v40  ;;  %v2078_v47 = vmul.f32 %v2382_v27, %v2063_v11  ;;  %v2064_v5 = vmul.f32 %v2914_v43, %v2008_v56 }
 0x785   : > { %2104 = vst [vmem:[%s4006_s11 + $0x18] sm:$0xff] %v2096_v44  ;;  %v2093_v33 = vadd.f32 %v2383_v30, %v2078_v47  ;;  %v2079_v49 = vmul.f32 %v2382_v27, %v2064_v5 }
 0x787   : > { %2101 = vst [vmem:[%s4006_s11] sm:$0xff] %v2093_v33  ;;  %v2094_v34 = vadd.f32 %v2383_v30, %v2079_v49 }
 0x789   : > { %2102 = vst [vmem:[%s4006_s11 + $0x8] sm:$0xff] %v2094_v34 }
 0x78c   : > { %v2032_v24 = vpop.xlane.xlu0 %2031 }
 0x78d   : > { %v2043_v50 = vmul.f32 0.0078125, %v2032_v24 }
 0x78e   : > { %v2034_v51 = vpop.xlane.xlu1 %2033 }
 0x78f   : > { %v2051_v37 = vadd.f32 1e-05, %v2043_v50  ;;  %v2044_v45 = vmul.f32 0.0078125, %v2034_v51 }
 0x790   : > { %v2036_v52 = vpop.xlane.xlu0 %2035 }
 0x791   : > { %2915 = vrsqrt.f32 %v2051_v37  ;;  %v2052_v53 = vadd.f32 1e-05, %v2044_v45  ;;  %v2045_v46 = vmul.f32 0.0078125, %v2036_v52 }
 0x792   : > { %v2038_v38 = vpop.xlane.xlu1 %2037 }
 0x793   : > { %2917 = vrsqrt.f32 %v2052_v53  ;;  %v2053_v10 = vadd.f32 1e-05, %v2045_v46  ;;  %v2046_v35 = vmul.f32 0.0078125, %v2038_v38 }
 0x795   : > { %2919 = vrsqrt.f32 %v2053_v10  ;;  %v2054_v48 = vadd.f32 1e-05, %v2046_v35 }
 0x797   : > { %2921 = vrsqrt.f32 %v2054_v48 }
 0x79b   : > { %v2916_v54 = vpop.eup %2915 }
 0x79c   : > { %v2067_v55 = vmul.f32 %v2916_v54, %v3982_v60 }
 0x79d   : > { %v2918_v36 = vpop.eup %2917 }
 0x79e   : > { %v2082_v56 = vmul.f32 %v2382_v27, %v2067_v55  ;;  %v2068_v41 = vmul.f32 %v2918_v36, %v3984_v0 }
 0x79f   : > { %v2920_v42 = vpop.eup %2919 }
 0x7a0   : > { %v2097_v57 = vadd.f32 %v2383_v30, %v2082_v56  ;;  %v2083_v58 = vmul.f32 %v2382_v27, %v2068_v41  ;;  %v2069_v59 = vmul.f32 %v2920_v42, %v3988_v4 }
 0x7a1   : > { %v2922_v62 = vpop.eup %2921 }
 0x7a2   : > { %2105 = vst [vmem:[%s4006_s11 + $0x20] sm:$0xff] %v2097_v57  ;;  %v2098_v63 = vadd.f32 %v2383_v30, %v2083_v58  ;;  %v2084_v1 = vmul.f32 %v2382_v27, %v2069_v59  ;;  %v2070_v2 = vmul.f32 %v2922_v62, %v3992_v7 }
 0x7a4   : > { %2106 = vst [vmem:[%s4006_s11 + $0x28] sm:$0xff] %v2098_v63  ;;  %v2099_v60 = vadd.f32 %v2383_v30, %v2084_v1  ;;  %v2085_v0 = vmul.f32 %v2382_v27, %v2070_v2 }
 0x7a6   : > { %2107 = vst [vmem:[%s4006_s11 + $0x30] sm:$0xff] %v2099_v60  ;;  %v2100_v3 = vadd.f32 %v2383_v30, %v2085_v0 }
 0x7a8   : > { %2108 = vst [vmem:[%s4006_s11 + $0x38] sm:$0xff] %v2100_v3 }
 0x7a9   : > { %3168 = shalt.err (!%p3165_p12)
}
 0x7aa   : > { %s3169_s20 = scalar_lea.hbm %s4023_s14, 1024  ;;  %s3173_s3 = scalar_lea.hbm %s4184_s5, 2048 }
 0x7ab   : > { %p3170_p11 = scmp.ne.s32.totalorder %s4023_s14, %s3169_s20  ;;  %p3174_p8 = scmp.lt.u32.totalorder %s4023_s14, %s4184_s5 }
 0x7ac   : > { %p3175_p7 = scmp.lt.u32.totalorder %s3173_s3, %s3169_s20  ;;  %p3177_p9 = scmp.lt.u32.totalorder %s3169_s20, %s4023_s14 }
 0x7ad   : > { %p3171_p13 = pnand %p3170_p11, %p4185_p3 }
 0x7ae   : > { %p3176_p2 = por %p3175_p7, %p3174_p8 }
 0x7af   : > { %p3172_p6 = pneg %p3171_p13 }
 0x7b0   : > { %p3178_p10 = por %p3177_p9, %p3176_p2 }
 0x7b2   : > { %p3179_p1 = pnand %p3178_p10, %p3172_p6 }
 0x7b4   : > { %3182 = shalt.err (!%p3179_p1)
}
 0x7b5   : > { %s3254_s9 = smov 128   ;;  %s3255_s26 = smov 8  }
 0x7b6   : > { %2750 = dma.vmem_to_hbm [thread:$0]  (%p4185_p3), %s4025_s16, 1024, %s4023_s14, %s2110_s0, %s3254_s9, %s3254_s9, %s3255_s26  }
 0x7b7 PF: > { %s4186_s27 = sld [smem:[#allocation23_spill]]  ;;  %s4187_s11 = sld [smem:[#allocation29_spill]] }
 0x7b8   : > { %p4189_p4 = scmp.ge.s32.totalorder %s3237_s24, 2 }
 0x7bd   : > { %s2139_s13 = sand.u32 1, %s4186_s27   ;;  %p4188_p5 = scmp.ne.s32.totalorder %s4187_s11, 0 }
 0x7be   : > { %s2140_s28 = scalar_lea.sflag [#allocation4], %s2139_s13 }
 0x7bf   : > { %p2779_p0 = pnand %p4189_p4, %p4188_p5 }
 0x7c1   : > { %3220 = dma.done.wait (!%p2779_p0), %s2140_s28, 1024  }
 0x7c2   : > { %3222 = vsyncadd (!%p2779_p0), %s2140_s28, 4294966272  ;;  %s4190_s24 = sld [smem:[#allocation26_spill]]  ;;  %s4191_s18 = sld [smem:[#allocation24_spill]] }
 0x7c3   : > { %s4192_s23 = sld [smem:[#allocation28_spill]]  ;;  %s4193_s21 = smov %s3229_s22 }
 0x7c8   : > { %p35_p12 = scmp.ge.s32.totalorder %s4190_s24, 4   ;;  %s4194_s22 = smov %s4191_s18 }
 0x7ca   :  { %37 = sbr.rel (!%p35_p12) target bundleno = 24 (0x18), region = 176 }
 0x7d1   :  { %2145 = vsyncpa [#allocation3], 1 }
 0x7d2   :  { %2147 = vsyncpa [#allocation3 + $0x1], 1 }
 0x7d3   :  { %2148 = vsyncpa [#allocation6], 1 }
 0x7d4   :  { %2150 = vsyncpa [#allocation6 + $0x1], 1 }
 0x7d5   :  { %2151 = vsyncpa [#allocation9], 1 }
 0x7d6   :  { %2152 = vsyncpa [#allocation12], 1 }
 0x7d7   :  { %2153 = vsyncpa [#allocation15], 1 }
 0x7d8   :  { %2154 = vsyncpa [#allocation4], 1 }
 0x7d9   :  { %2156 = vsyncpa [#allocation4 + $0x1], 1 }

</bundles_post_ra>
